<compile_context>
chip_gen: v6e
topology: v6e:2x2x1
jax: 0.10.0
libtpu: 0.0.40
codegen_flags: <defaults>
</compile_context>

<pallas_src>
import functools

import jax
import jax.numpy as jnp
from jax.experimental import pallas as pl
from jax.experimental.pallas import tpu as pltpu  # noqa: F401  (TPU backend)

# ----------------------------- configuration ---------------------------------
SPECTRUM_SIZE = 12
ACTION_SIZE = 4
FEATURE = SPECTRUM_SIZE + ACTION_SIZE          # 16
HIDDEN = 32
OUTPUT = 8
NUM_LAYERS_LSTM = 2
NUM_LAYERS_FC = 5
BATCH = 2
SEQ = 8
LN_EPS = 1e-5
LANES = 128

# ---- weight-slab row offsets (slab is (336, 128) f32) ----
_W_IH0 = 0                                      # W_ih layer 0        rows   0: 32
_W_HH0 = HIDDEN                                 # W_hh layer 0        rows  32: 64
_W_CAT1 = 2 * HIDDEN                            # [W_ih1; W_hh1]      rows  64:128
_W_FC0 = 4 * HIDDEN                             # w0 (16,32)          rows 128:144
_W_FCR = _W_FC0 + FEATURE                       # wr[i]               rows 144+32i
_W_FC1 = _W_FCR + (NUM_LAYERS_FC - 1) * HIDDEN  # w1                  rows 272:304
_W_FC2 = _W_FC1 + HIDDEN                        # w2 (lane-padded)    rows 304:336
_W_ROWS = _W_FC2 + HIDDEN                       # 336

# ---- vector-slab row offsets (slab is (16, 128) f32) ----
_V_B0, _V_BR = 0, 1                             # b0; br[0..3] rows 1..4
_V_LNF_G, _V_LNF_B = 5, 6
_V_LNL_G, _V_LNL_B = 7, 8
_V_B1, _V_B2 = 9, 10
_V_BL0, _V_BL1 = 11, 12                         # b_lstm[l] (full 128 lanes)
_V_ROWS = 16


def _layer_norm(x, gamma, beta):
    mean = jnp.mean(x, axis=-1, keepdims=True)
    var = jnp.mean((x - mean) ** 2, axis=-1, keepdims=True)
    return (x - mean) * jax.lax.rsqrt(var + LN_EPS) * gamma + beta


# ----------------------------- fused kernel ----------------------------------
def fclstm_kernel(x_ref, h0_ref, c0_ref, w_ref, v_ref, out_ref, *, batch, seq):
    H = HIDDEN
    B = batch
    BS = batch * seq

    # ---- FC stack (5x Linear+ReLU) + LayerNorm over all time-major rows at once ----
    y = jnp.maximum(
        jnp.dot(x_ref[...], w_ref[_W_FC0:_W_FC0 + FEATURE, 0:H],
                preferred_element_type=jnp.float32)
        + v_ref[_V_B0:_V_B0 + 1, 0:H], 0.0)
    for i in range(NUM_LAYERS_FC - 1):                        # static unroll
        r0 = _W_FCR + i * H
        y = jnp.maximum(
            jnp.dot(y, w_ref[r0:r0 + H, 0:H], preferred_element_type=jnp.float32)
            + v_ref[_V_BR + i:_V_BR + i + 1, 0:H], 0.0)
    feat = _layer_norm(y, v_ref[_V_LNF_G:_V_LNF_G + 1, 0:H],
                       v_ref[_V_LNF_B:_V_LNF_B + 1, 0:H])     # (BS, H), row = t*B + b

    # ---- layer-0 input gates for ALL timesteps: one big matmul off the recurrence ----
    gx0 = (jnp.dot(feat, w_ref[_W_IH0:_W_IH0 + H, :],
                   preferred_element_type=jnp.float32)
           + v_ref[_V_BL0:_V_BL0 + 1, :])                     # (BS, 4H), bias folded in

    # ---- 2-layer LSTM recurrence: time-major, (h, c) carried in vregs ----
    h = [h0_ref[l].astype(jnp.float32) for l in range(NUM_LAYERS_LSTM)]   # (B, H)
    c = [c0_ref[l].astype(jnp.float32) for l in range(NUM_LAYERS_LSTM)]
    top = []
    for t in range(seq):                                      # static unroll over time
        # layer 0: only the recurrent half stays on the serial critical path
        g0 = gx0[t * B:(t + 1) * B, :] + jnp.dot(
            h[0], w_ref[_W_HH0:_W_HH0 + H, :], preferred_element_type=jnp.float32)
        s0 = jax.nn.sigmoid(g0)                               # packed i,f,g,o
        c[0] = s0[:, H:2 * H] * c[0] + s0[:, 0:H] * jnp.tanh(g0[:, 2 * H:3 * H])
        h[0] = s0[:, 3 * H:4 * H] * jnp.tanh(c[0])
        # layer 1: combined [x; h] @ [W_ih1; W_hh1]
        z = jnp.concatenate([h[0], h[1]], axis=-1)            # (B, 2H)
        g1 = (jnp.dot(z, w_ref[_W_CAT1:_W_CAT1 + 2 * H, :],
                      preferred_element_type=jnp.float32)
              + v_ref[_V_BL1:_V_BL1 + 1, :])
        s1 = jax.nn.sigmoid(g1)
        c[1] = s1[:, H:2 * H] * c[1] + s1[:, 0:H] * jnp.tanh(g1[:, 2 * H:3 * H])
        h[1] = s1[:, 3 * H:4 * H] * jnp.tanh(c[1])
        top.append(h[1])                                      # contiguous (B, H) chunk

    # ---- head: LayerNorm -> fc1+ReLU -> dropout(p=0) -> fc2+tanh, batched ----
    hs = jnp.concatenate(top, axis=0)                         # (BS, H) time-major
    ln = _layer_norm(hs, v_ref[_V_LNL_G:_V_LNL_G + 1, 0:H],
                     v_ref[_V_LNL_B:_V_LNL_B + 1, 0:H])
    y1 = jnp.maximum(
        jnp.dot(ln, w_ref[_W_FC1:_W_FC1 + H, 0:H], preferred_element_type=jnp.float32)
        + v_ref[_V_B1:_V_B1 + 1, 0:H], 0.0)
    # w2/b2 are zero-padded to 32 lanes -> lanes OUTPUT..31 end up tanh(0)=0
    y2 = jnp.tanh(
        jnp.dot(y1, w_ref[_W_FC2:_W_FC2 + H, 0:H], preferred_element_type=jnp.float32)
        + v_ref[_V_B2:_V_B2 + 1, 0:H])                        # (BS, H)

    # ---- single lane-dense (BS, 128) output slab: one unmasked store, one DMA ----
    hc = jnp.concatenate([h[0], h[1], c[0], c[1]], axis=0)    # (4B, H)
    hc = jnp.concatenate(
        [hc, jnp.zeros((BS - 4 * B, H), jnp.float32)], axis=0)  # (BS, H)  (seq >= 4)
    pad = jnp.zeros((BS, LANES - 2 * H), jnp.float32)
    out_ref[...] = jnp.concatenate([y2, hc, pad], axis=-1)    # (BS, 128)


# ----------------------------- param packing (once, outside per-call path) ----
def pack_params(p):
    """Pack all weight matrices into one 128-lane slab and all vectors into another."""
    H = HIDDEN

    def lane_pad(m):
        m = m.astype(jnp.float32)
        return jnp.pad(m, ((0, 0), (0, LANES - m.shape[1])))

    w2_pad = jnp.pad(p["w2"].astype(jnp.float32), ((0, 0), (0, H - OUTPUT)))
    w_slab = jnp.concatenate(
        [p["wih"][0], p["whh"][0], p["wih"][1], p["whh"][1], lane_pad(p["w0"])]
        + [lane_pad(p["wr"][i]) for i in range(NUM_LAYERS_FC - 1)]
        + [lane_pad(p["w1"]), lane_pad(w2_pad)], axis=0).astype(jnp.float32)

    b2_pad = jnp.pad(p["b2"].astype(jnp.float32), ((0, 0), (0, H - OUTPUT)))
    v_slab = jnp.concatenate(
        [lane_pad(p["b0"])]
        + [lane_pad(p["br"][i:i + 1]) for i in range(NUM_LAYERS_FC - 1)]
        + [lane_pad(p["ln_f_g"]), lane_pad(p["ln_f_b"]),
           lane_pad(p["ln_l_g"]), lane_pad(p["ln_l_b"]),
           lane_pad(p["b1"]), lane_pad(b2_pad),
           p["b_lstm"][0:1].astype(jnp.float32), p["b_lstm"][1:2].astype(jnp.float32),
           jnp.zeros((_V_ROWS - 13, LANES), jnp.float32)], axis=0)

    assert w_slab.shape == (_W_ROWS, LANES)
    assert v_slab.shape == (_V_ROWS, LANES)
    return w_slab, v_slab


# ----------------------------- wrapper ----------------------------------------
@jax.jit
def fclstm_forward(inputs, h0, c0, w_slab, v_slab):
    """inputs: (B, S, FEATURE); h0, c0: (L, B, H). Returns (x, (h_n, c_n))."""
    B, S, F = inputs.shape
    # time-major flattened input (row = t*B + b); transpose is free at this size
    x_tm = jnp.transpose(inputs.astype(jnp.float32), (1, 0, 2)).reshape(S * B, F)
    kernel = functools.partial(fclstm_kernel, batch=B, seq=S)
    slab = pl.pallas_call(
        kernel,
        out_shape=jax.ShapeDtypeStruct((S * B, LANES), jnp.float32),
    )(x_tm, h0, c0, w_slab, v_slab)
    x = slab[:, :OUTPUT].reshape(S, B, OUTPUT).transpose(1, 0, 2)
    h_n = slab[0:NUM_LAYERS_LSTM * B, HIDDEN:2 * HIDDEN].reshape(
        NUM_LAYERS_LSTM, B, HIDDEN)
    c_n = slab[NUM_LAYERS_LSTM * B:2 * NUM_LAYERS_LSTM * B, HIDDEN:2 * HIDDEN].reshape(
        NUM_LAYERS_LSTM, B, HIDDEN)
    return x, (h_n, c_n)


# ----------------------------- pure-JAX reference -----------------------------
def reference_forward(inputs, h0, c0, p):
    y = inputs.astype(jnp.float32)
    y = jnp.maximum(y @ p["w0"] + p["b0"][0], 0.0)
    for i in range(NUM_LAYERS_FC - 1):
        y = jnp.maximum(y @ p["wr"][i] + p["br"][i], 0.0)
    mean = jnp.mean(y, -1, keepdims=True)
    var = jnp.mean((y - mean) ** 2, -1, keepdims=True)
    y = (y - mean) * jax.lax.rsqrt(var + LN_EPS) * p["ln_f_g"][0] + p["ln_f_b"][0]

    H = HIDDEN
    h = [h0[l] for l in range(NUM_LAYERS_LSTM)]
    c = [c0[l] for l in range(NUM_LAYERS_LSTM)]
    outs = []
    for t in range(y.shape[1]):
        inp = y[:, t, :]
        for l in range(NUM_LAYERS_LSTM):
            gates = inp @ p["wih"][l] + h[l] @ p["whh"][l] + p["b_lstm"][l]
            i_g = jax.nn.sigmoid(gates[:, :H])
            f_g = jax.nn.sigmoid(gates[:, H:2 * H])
            g_g = jnp.tanh(gates[:, 2 * H:3 * H])
            o_g = jax.nn.sigmoid(gates[:, 3 * H:])
            c[l] = f_g * c[l] + i_g * g_g
            h[l] = o_g * jnp.tanh(c[l])
            inp = h[l]
        outs.append(inp)
    out = jnp.stack(outs, axis=1)
    mean = jnp.mean(out, -1, keepdims=True)
    var = jnp.mean((out - mean) ** 2, -1, keepdims=True)
    out = (out - mean) * jax.lax.rsqrt(var + LN_EPS) * p["ln_l_g"][0] + p["ln_l_b"][0]
    x = jnp.maximum(out @ p["w1"] + p["b1"][0], 0.0)
    x = jnp.tanh(x @ p["w2"] + p["b2"][0])
    return x, (jnp.stack(h), jnp.stack(c))


# ----------------------------- parameter init ---------------------------------
def init_params(key):
    ks = jax.random.split(key, 16)
    u = lambda k, shp: jax.random.uniform(k, shp, jnp.float32, -0.1, 0.1)
    # Linear weights stored as (in, out) (transpose of PyTorch's (out, in)).
    params = {
        "w0": u(ks[0], (FEATURE, HIDDEN)),
        "b0": u(ks[1], (1, HIDDEN)),
        "wr": u(ks[2], (NUM_LAYERS_FC - 1, HIDDEN, HIDDEN)),
        "br": u(ks[3], (NUM_LAYERS_FC - 1, HIDDEN)),
        "ln_f_g": jnp.ones((1, HIDDEN), jnp.float32),
        "ln_f_b": jnp.zeros((1, HIDDEN), jnp.float32),
        # LSTM: W_ih/W_hh stored as (layers, in, 4H); gate order i,f,g,o.
        "wih": u(ks[4], (NUM_LAYERS_LSTM, HIDDEN, 4 * HIDDEN)),
        "whh": u(ks[5], (NUM_LAYERS_LSTM, HIDDEN, 4 * HIDDEN)),
        # b_lstm = b_ih + b_hh (PyTorch keeps them separate; sum is equivalent).
        "b_lstm": u(ks[6], (NUM_LAYERS_LSTM, 4 * HIDDEN))
                  + u(ks[7], (NUM_LAYERS_LSTM, 4 * HIDDEN)),
        "ln_l_g": jnp.ones((1, HIDDEN), jnp.float32),
        "ln_l_b": jnp.zeros((1, HIDDEN), jnp.float32),
        "w1": u(ks[8], (HIDDEN, HIDDEN)),
        "b1": u(ks[9], (1, HIDDEN)),
        "w2": u(ks[10], (HIDDEN, OUTPUT)),
        "b2": u(ks[11], (1, OUTPUT)),
    }
    return params


# ----------------------------- main -------------------------------------------
if __name__ == "__main__":
    key = jax.random.PRNGKey(0)
    k_in, k_par = jax.random.split(key)
    inputs = jax.random.normal(k_in, (BATCH, SEQ, FEATURE), jnp.float32)
    # initHidden(batch_size): zeros of shape (num_layers_lstm, batch, hidden)
    h0 = jnp.zeros((NUM_LAYERS_LSTM, BATCH, HIDDEN), jnp.float32)
    c0 = jnp.zeros((NUM_LAYERS_LSTM, BATCH, HIDDEN), jnp.float32)
    params = init_params(k_par)

    # parameter slabs built ONCE, outside the per-call path
    w_slab, v_slab = pack_params(params)
    w_slab, v_slab = jax.block_until_ready((w_slab, v_slab))

    x, (h_n, c_n) = fclstm_forward(inputs, h0, c0, w_slab, v_slab)
    jax.block_until_ready((x, h_n, c_n))

    # correctness check against a pure-JAX reference of the PyTorch semantics
    x_ref, (h_ref, c_ref) = reference_forward(inputs, h0, c0, params)
    assert x.shape == (BATCH, SEQ, OUTPUT)
    assert h_n.shape == (NUM_LAYERS_LSTM, BATCH, HIDDEN)
    assert c_n.shape == (NUM_LAYERS_LSTM, BATCH, HIDDEN)
    assert jnp.allclose(x, x_ref, rtol=1e-4, atol=1e-4)
    assert jnp.allclose(h_n, h_ref, rtol=1e-4, atol=1e-4)
    assert jnp.allclose(c_n, c_ref, rtol=1e-4, atol=1e-4)

    print("KERNEL_OK")
</pallas_src>

<mosaic_0001>
module attributes {stable_mosaic.version = 11 : i64} {
  func.func @fclstm_kernel(%arg0: memref<16x16xf32, #tpu.memory_space<vmem>>, %arg1: memref<2x2x32xf32, #tpu.memory_space<vmem>>, %arg2: memref<2x2x32xf32, #tpu.memory_space<vmem>>, %arg3: memref<336x128xf32, #tpu.memory_space<vmem>>, %arg4: memref<16x128xf32, #tpu.memory_space<vmem>>, %arg5: memref<16x128xf32, #tpu.memory_space<vmem>>) attributes {dimension_semantics = [], scalar_prefetch = 0 : i64, scratch_operands = 0 : i64, tpu.core_type = #tpu.core_type<tc>} {
    %c0 = arith.constant 0 : index
    %c0_0 = arith.constant 0 : index
    %0 = vector.load %arg0[%c0, %c0_0] : memref<16x16xf32, #tpu.memory_space<vmem>>, vector<16x16xf32>
    %c128 = arith.constant 128 : index
    %c0_1 = arith.constant 0 : index
    %1 = vector.load %arg3[%c128, %c0_1] : memref<336x128xf32, #tpu.memory_space<vmem>>, vector<16x32xf32>
    %cst = arith.constant dense<0.000000e+00> : vector<16x32xf32>
    %2 = tpu.matmul %0, %1, %cst {dimension_numbers = #tpu.dot_dimension_numbers<[1], [0], [0], [1], [0, 0, 1, 1], [], []>} : vector<16x16xf32>, vector<16x32xf32>, vector<16x32xf32> -> vector<16x32xf32>
    %c0_2 = arith.constant 0 : index
    %c0_3 = arith.constant 0 : index
    %3 = vector.load %arg4[%c0_2, %c0_3] : memref<16x128xf32, #tpu.memory_space<vmem>>, vector<1x32xf32>
    %4 = vector.broadcast %3 : vector<1x32xf32> to vector<16x32xf32>
    %5 = arith.addf %2, %4 : vector<16x32xf32>
    %cst_4 = arith.constant 0.000000e+00 : f32
    %6 = vector.broadcast %cst_4 : f32 to vector<16x32xf32>
    %7 = arith.maximumf %5, %6 : vector<16x32xf32>
    %c144 = arith.constant 144 : index
    %c0_5 = arith.constant 0 : index
    %8 = vector.load %arg3[%c144, %c0_5] : memref<336x128xf32, #tpu.memory_space<vmem>>, vector<32x32xf32>
    %cst_6 = arith.constant dense<0.000000e+00> : vector<16x32xf32>
    %9 = tpu.matmul %7, %8, %cst_6 {dimension_numbers = #tpu.dot_dimension_numbers<[1], [0], [0], [1], [0, 0, 1, 1], [], []>} : vector<16x32xf32>, vector<32x32xf32>, vector<16x32xf32> -> vector<16x32xf32>
    %c1 = arith.constant 1 : index
    %c0_7 = arith.constant 0 : index
    %10 = vector.load %arg4[%c1, %c0_7] : memref<16x128xf32, #tpu.memory_space<vmem>>, vector<1x32xf32>
    %11 = vector.broadcast %10 : vector<1x32xf32> to vector<16x32xf32>
    %12 = arith.addf %9, %11 : vector<16x32xf32>
    %cst_8 = arith.constant 0.000000e+00 : f32
    %13 = vector.broadcast %cst_8 : f32 to vector<16x32xf32>
    %14 = arith.maximumf %12, %13 : vector<16x32xf32>
    %c176 = arith.constant 176 : index
    %c0_9 = arith.constant 0 : index
    %15 = vector.load %arg3[%c176, %c0_9] : memref<336x128xf32, #tpu.memory_space<vmem>>, vector<32x32xf32>
    %cst_10 = arith.constant dense<0.000000e+00> : vector<16x32xf32>
    %16 = tpu.matmul %14, %15, %cst_10 {dimension_numbers = #tpu.dot_dimension_numbers<[1], [0], [0], [1], [0, 0, 1, 1], [], []>} : vector<16x32xf32>, vector<32x32xf32>, vector<16x32xf32> -> vector<16x32xf32>
    %c2 = arith.constant 2 : index
    %c0_11 = arith.constant 0 : index
    %17 = vector.load %arg4[%c2, %c0_11] : memref<16x128xf32, #tpu.memory_space<vmem>>, vector<1x32xf32>
    %18 = vector.broadcast %17 : vector<1x32xf32> to vector<16x32xf32>
    %19 = arith.addf %16, %18 : vector<16x32xf32>
    %cst_12 = arith.constant 0.000000e+00 : f32
    %20 = vector.broadcast %cst_12 : f32 to vector<16x32xf32>
    %21 = arith.maximumf %19, %20 : vector<16x32xf32>
    %c208 = arith.constant 208 : index
    %c0_13 = arith.constant 0 : index
    %22 = vector.load %arg3[%c208, %c0_13] : memref<336x128xf32, #tpu.memory_space<vmem>>, vector<32x32xf32>
    %cst_14 = arith.constant dense<0.000000e+00> : vector<16x32xf32>
    %23 = tpu.matmul %21, %22, %cst_14 {dimension_numbers = #tpu.dot_dimension_numbers<[1], [0], [0], [1], [0, 0, 1, 1], [], []>} : vector<16x32xf32>, vector<32x32xf32>, vector<16x32xf32> -> vector<16x32xf32>
    %c3 = arith.constant 3 : index
    %c0_15 = arith.constant 0 : index
    %24 = vector.load %arg4[%c3, %c0_15] : memref<16x128xf32, #tpu.memory_space<vmem>>, vector<1x32xf32>
    %25 = vector.broadcast %24 : vector<1x32xf32> to vector<16x32xf32>
    %26 = arith.addf %23, %25 : vector<16x32xf32>
    %cst_16 = arith.constant 0.000000e+00 : f32
    %27 = vector.broadcast %cst_16 : f32 to vector<16x32xf32>
    %28 = arith.maximumf %26, %27 : vector<16x32xf32>
    %c240 = arith.constant 240 : index
    %c0_17 = arith.constant 0 : index
    %29 = vector.load %arg3[%c240, %c0_17] : memref<336x128xf32, #tpu.memory_space<vmem>>, vector<32x32xf32>
    %cst_18 = arith.constant dense<0.000000e+00> : vector<16x32xf32>
    %30 = tpu.matmul %28, %29, %cst_18 {dimension_numbers = #tpu.dot_dimension_numbers<[1], [0], [0], [1], [0, 0, 1, 1], [], []>} : vector<16x32xf32>, vector<32x32xf32>, vector<16x32xf32> -> vector<16x32xf32>
    %c4 = arith.constant 4 : index
    %c0_19 = arith.constant 0 : index
    %31 = vector.load %arg4[%c4, %c0_19] : memref<16x128xf32, #tpu.memory_space<vmem>>, vector<1x32xf32>
    %32 = vector.broadcast %31 : vector<1x32xf32> to vector<16x32xf32>
    %33 = arith.addf %30, %32 : vector<16x32xf32>
    %cst_20 = arith.constant 0.000000e+00 : f32
    %34 = vector.broadcast %cst_20 : f32 to vector<16x32xf32>
    %35 = arith.maximumf %33, %34 : vector<16x32xf32>
    %c5 = arith.constant 5 : index
    %c0_21 = arith.constant 0 : index
    %36 = vector.load %arg4[%c5, %c0_21] : memref<16x128xf32, #tpu.memory_space<vmem>>, vector<1x32xf32>
    %c6 = arith.constant 6 : index
    %c0_22 = arith.constant 0 : index
    %37 = vector.load %arg4[%c6, %c0_22] : memref<16x128xf32, #tpu.memory_space<vmem>>, vector<1x32xf32>
    %cst_23 = arith.constant dense<0.000000e+00> : vector<16xf32>
    %38 = vector.multi_reduction <add>, %35, %cst_23 [1] : vector<16x32xf32> to vector<16xf32>
    %39 = vector.shape_cast %38 : vector<16xf32> to vector<16x1xf32>
    %cst_24 = arith.constant 3.200000e+01 : f32
    %40 = vector.broadcast %cst_24 : f32 to vector<16x1xf32>
    %41 = arith.divf %39, %40 : vector<16x1xf32>
    %42 = vector.broadcast %41 : vector<16x1xf32> to vector<16x32xf32>
    %43 = arith.subf %35, %42 : vector<16x32xf32>
    %44 = arith.mulf %43, %43 : vector<16x32xf32>
    %cst_25 = arith.constant dense<0.000000e+00> : vector<16xf32>
    %45 = vector.multi_reduction <add>, %44, %cst_25 [1] : vector<16x32xf32> to vector<16xf32>
    %46 = vector.shape_cast %45 : vector<16xf32> to vector<16x1xf32>
    %cst_26 = arith.constant 3.200000e+01 : f32
    %47 = vector.broadcast %cst_26 : f32 to vector<16x1xf32>
    %48 = arith.divf %46, %47 : vector<16x1xf32>
    %49 = vector.broadcast %41 : vector<16x1xf32> to vector<16x32xf32>
    %50 = arith.subf %35, %49 : vector<16x32xf32>
    %cst_27 = arith.constant 9.99999974E-6 : f32
    %51 = vector.broadcast %cst_27 : f32 to vector<16x1xf32>
    %52 = arith.addf %48, %51 : vector<16x1xf32>
    %53 = math.rsqrt %52 : vector<16x1xf32>
    %54 = vector.broadcast %53 : vector<16x1xf32> to vector<16x32xf32>
    %55 = arith.mulf %50, %54 : vector<16x32xf32>
    %56 = vector.broadcast %36 : vector<1x32xf32> to vector<16x32xf32>
    %57 = arith.mulf %55, %56 : vector<16x32xf32>
    %58 = vector.broadcast %37 : vector<1x32xf32> to vector<16x32xf32>
    %59 = arith.addf %57, %58 : vector<16x32xf32>
    %c0_28 = arith.constant 0 : index
    %c0_29 = arith.constant 0 : index
    %60 = vector.load %arg3[%c0_28, %c0_29] : memref<336x128xf32, #tpu.memory_space<vmem>>, vector<32x128xf32>
    %cst_30 = arith.constant dense<0.000000e+00> : vector<16x128xf32>
    %61 = tpu.matmul %59, %60, %cst_30 {dimension_numbers = #tpu.dot_dimension_numbers<[1], [0], [0], [1], [0, 0, 1, 1], [], []>} : vector<16x32xf32>, vector<32x128xf32>, vector<16x128xf32> -> vector<16x128xf32>
    %c11 = arith.constant 11 : index
    %c0_31 = arith.constant 0 : index
    %62 = vector.load %arg4[%c11, %c0_31] : memref<16x128xf32, #tpu.memory_space<vmem>>, vector<1x128xf32>
    %63 = vector.broadcast %62 : vector<1x128xf32> to vector<16x128xf32>
    %64 = arith.addf %61, %63 : vector<16x128xf32>
    %c0_32 = arith.constant 0 : index
    %c0_33 = arith.constant 0 : index
    %c0_34 = arith.constant 0 : index
    %65 = vector.load %arg1[%c0_32, %c0_33, %c0_34] : memref<2x2x32xf32, #tpu.memory_space<vmem>>, vector<1x2x32xf32>
    %66 = vector.shape_cast %65 : vector<1x2x32xf32> to vector<2x32xf32>
    %c1_35 = arith.constant 1 : index
    %c0_36 = arith.constant 0 : index
    %c0_37 = arith.constant 0 : index
    %67 = vector.load %arg1[%c1_35, %c0_36, %c0_37] : memref<2x2x32xf32, #tpu.memory_space<vmem>>, vector<1x2x32xf32>
    %68 = vector.shape_cast %67 : vector<1x2x32xf32> to vector<2x32xf32>
    %c0_38 = arith.constant 0 : index
    %c0_39 = arith.constant 0 : index
    %c0_40 = arith.constant 0 : index
    %69 = vector.load %arg2[%c0_38, %c0_39, %c0_40] : memref<2x2x32xf32, #tpu.memory_space<vmem>>, vector<1x2x32xf32>
    %70 = vector.shape_cast %69 : vector<1x2x32xf32> to vector<2x32xf32>
    %c1_41 = arith.constant 1 : index
    %c0_42 = arith.constant 0 : index
    %c0_43 = arith.constant 0 : index
    %71 = vector.load %arg2[%c1_41, %c0_42, %c0_43] : memref<2x2x32xf32, #tpu.memory_space<vmem>>, vector<1x2x32xf32>
    %72 = vector.shape_cast %71 : vector<1x2x32xf32> to vector<2x32xf32>
    %73 = vector.extract_strided_slice %64 {offsets = [0, 0], sizes = [2, 128], strides = [1, 1]} : vector<16x128xf32> to vector<2x128xf32>
    %c32 = arith.constant 32 : index
    %c0_44 = arith.constant 0 : index
    %74 = vector.load %arg3[%c32, %c0_44] : memref<336x128xf32, #tpu.memory_space<vmem>>, vector<32x128xf32>
    %cst_45 = arith.constant dense<0.000000e+00> : vector<2x128xf32>
    %75 = tpu.matmul %66, %74, %cst_45 {dimension_numbers = #tpu.dot_dimension_numbers<[1], [0], [0], [1], [0, 0, 1, 1], [], []>} : vector<2x32xf32>, vector<32x128xf32>, vector<2x128xf32> -> vector<2x128xf32>
    %76 = arith.addf %73, %75 : vector<2x128xf32>
    %77 = arith.negf %76 : vector<2x128xf32>
    %78 = math.exp %77 : vector<2x128xf32>
    %cst_46 = arith.constant 1.000000e+00 : f32
    %79 = vector.broadcast %cst_46 : f32 to vector<2x128xf32>
    %80 = arith.addf %79, %78 : vector<2x128xf32>
    %81 = arith.divf %79, %80 : vector<2x128xf32>
    %82 = vector.extract_strided_slice %81 {offsets = [0, 32], sizes = [2, 32], strides = [1, 1]} : vector<2x128xf32> to vector<2x32xf32>
    %83 = arith.mulf %82, %70 : vector<2x32xf32>
    %84 = vector.extract_strided_slice %81 {offsets = [0, 0], sizes = [2, 32], strides = [1, 1]} : vector<2x128xf32> to vector<2x32xf32>
    %85 = vector.extract_strided_slice %76 {offsets = [0, 64], sizes = [2, 32], strides = [1, 1]} : vector<2x128xf32> to vector<2x32xf32>
    %86 = math.tanh %85 : vector<2x32xf32>
    %87 = arith.mulf %84, %86 : vector<2x32xf32>
    %88 = arith.addf %83, %87 : vector<2x32xf32>
    %89 = vector.extract_strided_slice %81 {offsets = [0, 96], sizes = [2, 32], strides = [1, 1]} : vector<2x128xf32> to vector<2x32xf32>
    %90 = math.tanh %88 : vector<2x32xf32>
    %91 = arith.mulf %89, %90 : vector<2x32xf32>
    %92 = tpu.concatenate %91, %68 in 1 : vector<2x32xf32>, vector<2x32xf32> -> vector<2x64xf32>
    %c64 = arith.constant 64 : index
    %c0_47 = arith.constant 0 : index
    %93 = vector.load %arg3[%c64, %c0_47] : memref<336x128xf32, #tpu.memory_space<vmem>>, vector<64x128xf32>
    %cst_48 = arith.constant dense<0.000000e+00> : vector<2x128xf32>
    %94 = tpu.matmul %92, %93, %cst_48 {dimension_numbers = #tpu.dot_dimension_numbers<[1], [0], [0], [1], [0, 0, 1, 1], [], []>} : vector<2x64xf32>, vector<64x128xf32>, vector<2x128xf32> -> vector<2x128xf32>
    %c12 = arith.constant 12 : index
    %c0_49 = arith.constant 0 : index
    %95 = vector.load %arg4[%c12, %c0_49] : memref<16x128xf32, #tpu.memory_space<vmem>>, vector<1x128xf32>
    %96 = vector.broadcast %95 : vector<1x128xf32> to vector<2x128xf32>
    %97 = arith.addf %94, %96 : vector<2x128xf32>
    %98 = arith.negf %97 : vector<2x128xf32>
    %99 = math.exp %98 : vector<2x128xf32>
    %cst_50 = arith.constant 1.000000e+00 : f32
    %100 = vector.broadcast %cst_50 : f32 to vector<2x128xf32>
    %101 = arith.addf %100, %99 : vector<2x128xf32>
    %102 = arith.divf %100, %101 : vector<2x128xf32>
    %103 = vector.extract_strided_slice %102 {offsets = [0, 32], sizes = [2, 32], strides = [1, 1]} : vector<2x128xf32> to vector<2x32xf32>
    %104 = arith.mulf %103, %72 : vector<2x32xf32>
    %105 = vector.extract_strided_slice %102 {offsets = [0, 0], sizes = [2, 32], strides = [1, 1]} : vector<2x128xf32> to vector<2x32xf32>
    %106 = vector.extract_strided_slice %97 {offsets = [0, 64], sizes = [2, 32], strides = [1, 1]} : vector<2x128xf32> to vector<2x32xf32>
    %107 = math.tanh %106 : vector<2x32xf32>
    %108 = arith.mulf %105, %107 : vector<2x32xf32>
    %109 = arith.addf %104, %108 : vector<2x32xf32>
    %110 = vector.extract_strided_slice %102 {offsets = [0, 96], sizes = [2, 32], strides = [1, 1]} : vector<2x128xf32> to vector<2x32xf32>
    %111 = math.tanh %109 : vector<2x32xf32>
    %112 = arith.mulf %110, %111 : vector<2x32xf32>
    %113 = vector.extract_strided_slice %64 {offsets = [2, 0], sizes = [2, 128], strides = [1, 1]} : vector<16x128xf32> to vector<2x128xf32>
    %c32_51 = arith.constant 32 : index
    %c0_52 = arith.constant 0 : index
    %114 = vector.load %arg3[%c32_51, %c0_52] : memref<336x128xf32, #tpu.memory_space<vmem>>, vector<32x128xf32>
    %cst_53 = arith.constant dense<0.000000e+00> : vector<2x128xf32>
    %115 = tpu.matmul %91, %114, %cst_53 {dimension_numbers = #tpu.dot_dimension_numbers<[1], [0], [0], [1], [0, 0, 1, 1], [], []>} : vector<2x32xf32>, vector<32x128xf32>, vector<2x128xf32> -> vector<2x128xf32>
    %116 = arith.addf %113, %115 : vector<2x128xf32>
    %117 = arith.negf %116 : vector<2x128xf32>
    %118 = math.exp %117 : vector<2x128xf32>
    %cst_54 = arith.constant 1.000000e+00 : f32
    %119 = vector.broadcast %cst_54 : f32 to vector<2x128xf32>
    %120 = arith.addf %119, %118 : vector<2x128xf32>
    %121 = arith.divf %119, %120 : vector<2x128xf32>
    %122 = vector.extract_strided_slice %121 {offsets = [0, 32], sizes = [2, 32], strides = [1, 1]} : vector<2x128xf32> to vector<2x32xf32>
    %123 = arith.mulf %122, %88 : vector<2x32xf32>
    %124 = vector.extract_strided_slice %121 {offsets = [0, 0], sizes = [2, 32], strides = [1, 1]} : vector<2x128xf32> to vector<2x32xf32>
    %125 = vector.extract_strided_slice %116 {offsets = [0, 64], sizes = [2, 32], strides = [1, 1]} : vector<2x128xf32> to vector<2x32xf32>
    %126 = math.tanh %125 : vector<2x32xf32>
    %127 = arith.mulf %124, %126 : vector<2x32xf32>
    %128 = arith.addf %123, %127 : vector<2x32xf32>
    %129 = vector.extract_strided_slice %121 {offsets = [0, 96], sizes = [2, 32], strides = [1, 1]} : vector<2x128xf32> to vector<2x32xf32>
    %130 = math.tanh %128 : vector<2x32xf32>
    %131 = arith.mulf %129, %130 : vector<2x32xf32>
    %132 = tpu.concatenate %131, %112 in 1 : vector<2x32xf32>, vector<2x32xf32> -> vector<2x64xf32>
    %c64_55 = arith.constant 64 : index
    %c0_56 = arith.constant 0 : index
    %133 = vector.load %arg3[%c64_55, %c0_56] : memref<336x128xf32, #tpu.memory_space<vmem>>, vector<64x128xf32>
    %cst_57 = arith.constant dense<0.000000e+00> : vector<2x128xf32>
    %134 = tpu.matmul %132, %133, %cst_57 {dimension_numbers = #tpu.dot_dimension_numbers<[1], [0], [0], [1], [0, 0, 1, 1], [], []>} : vector<2x64xf32>, vector<64x128xf32>, vector<2x128xf32> -> vector<2x128xf32>
    %c12_58 = arith.constant 12 : index
    %c0_59 = arith.constant 0 : index
    %135 = vector.load %arg4[%c12_58, %c0_59] : memref<16x128xf32, #tpu.memory_space<vmem>>, vector<1x128xf32>
    %136 = vector.broadcast %135 : vector<1x128xf32> to vector<2x128xf32>
    %137 = arith.addf %134, %136 : vector<2x128xf32>
    %138 = arith.negf %137 : vector<2x128xf32>
    %139 = math.exp %138 : vector<2x128xf32>
    %cst_60 = arith.constant 1.000000e+00 : f32
    %140 = vector.broadcast %cst_60 : f32 to vector<2x128xf32>
    %141 = arith.addf %140, %139 : vector<2x128xf32>
    %142 = arith.divf %140, %141 : vector<2x128xf32>
    %143 = vector.extract_strided_slice %142 {offsets = [0, 32], sizes = [2, 32], strides = [1, 1]} : vector<2x128xf32> to vector<2x32xf32>
    %144 = arith.mulf %143, %109 : vector<2x32xf32>
    %145 = vector.extract_strided_slice %142 {offsets = [0, 0], sizes = [2, 32], strides = [1, 1]} : vector<2x128xf32> to vector<2x32xf32>
    %146 = vector.extract_strided_slice %137 {offsets = [0, 64], sizes = [2, 32], strides = [1, 1]} : vector<2x128xf32> to vector<2x32xf32>
    %147 = math.tanh %146 : vector<2x32xf32>
    %148 = arith.mulf %145, %147 : vector<2x32xf32>
    %149 = arith.addf %144, %148 : vector<2x32xf32>
    %150 = vector.extract_strided_slice %142 {offsets = [0, 96], sizes = [2, 32], strides = [1, 1]} : vector<2x128xf32> to vector<2x32xf32>
    %151 = math.tanh %149 : vector<2x32xf32>
    %152 = arith.mulf %150, %151 : vector<2x32xf32>
    %153 = vector.extract_strided_slice %64 {offsets = [4, 0], sizes = [2, 128], strides = [1, 1]} : vector<16x128xf32> to vector<2x128xf32>
    %c32_61 = arith.constant 32 : index
    %c0_62 = arith.constant 0 : index
    %154 = vector.load %arg3[%c32_61, %c0_62] : memref<336x128xf32, #tpu.memory_space<vmem>>, vector<32x128xf32>
    %cst_63 = arith.constant dense<0.000000e+00> : vector<2x128xf32>
    %155 = tpu.matmul %131, %154, %cst_63 {dimension_numbers = #tpu.dot_dimension_numbers<[1], [0], [0], [1], [0, 0, 1, 1], [], []>} : vector<2x32xf32>, vector<32x128xf32>, vector<2x128xf32> -> vector<2x128xf32>
    %156 = arith.addf %153, %155 : vector<2x128xf32>
    %157 = arith.negf %156 : vector<2x128xf32>
    %158 = math.exp %157 : vector<2x128xf32>
    %cst_64 = arith.constant 1.000000e+00 : f32
    %159 = vector.broadcast %cst_64 : f32 to vector<2x128xf32>
    %160 = arith.addf %159, %158 : vector<2x128xf32>
    %161 = arith.divf %159, %160 : vector<2x128xf32>
    %162 = vector.extract_strided_slice %161 {offsets = [0, 32], sizes = [2, 32], strides = [1, 1]} : vector<2x128xf32> to vector<2x32xf32>
    %163 = arith.mulf %162, %128 : vector<2x32xf32>
    %164 = vector.extract_strided_slice %161 {offsets = [0, 0], sizes = [2, 32], strides = [1, 1]} : vector<2x128xf32> to vector<2x32xf32>
    %165 = vector.extract_strided_slice %156 {offsets = [0, 64], sizes = [2, 32], strides = [1, 1]} : vector<2x128xf32> to vector<2x32xf32>
    %166 = math.tanh %165 : vector<2x32xf32>
    %167 = arith.mulf %164, %166 : vector<2x32xf32>
    %168 = arith.addf %163, %167 : vector<2x32xf32>
    %169 = vector.extract_strided_slice %161 {offsets = [0, 96], sizes = [2, 32], strides = [1, 1]} : vector<2x128xf32> to vector<2x32xf32>
    %170 = math.tanh %168 : vector<2x32xf32>
    %171 = arith.mulf %169, %170 : vector<2x32xf32>
    %172 = tpu.concatenate %171, %152 in 1 : vector<2x32xf32>, vector<2x32xf32> -> vector<2x64xf32>
    %c64_65 = arith.constant 64 : index
    %c0_66 = arith.constant 0 : index
    %173 = vector.load %arg3[%c64_65, %c0_66] : memref<336x128xf32, #tpu.memory_space<vmem>>, vector<64x128xf32>
    %cst_67 = arith.constant dense<0.000000e+00> : vector<2x128xf32>
    %174 = tpu.matmul %172, %173, %cst_67 {dimension_numbers = #tpu.dot_dimension_numbers<[1], [0], [0], [1], [0, 0, 1, 1], [], []>} : vector<2x64xf32>, vector<64x128xf32>, vector<2x128xf32> -> vector<2x128xf32>
    %c12_68 = arith.constant 12 : index
    %c0_69 = arith.constant 0 : index
    %175 = vector.load %arg4[%c12_68, %c0_69] : memref<16x128xf32, #tpu.memory_space<vmem>>, vector<1x128xf32>
    %176 = vector.broadcast %175 : vector<1x128xf32> to vector<2x128xf32>
    %177 = arith.addf %174, %176 : vector<2x128xf32>
    %178 = arith.negf %177 : vector<2x128xf32>
    %179 = math.exp %178 : vector<2x128xf32>
    %cst_70 = arith.constant 1.000000e+00 : f32
    %180 = vector.broadcast %cst_70 : f32 to vector<2x128xf32>
    %181 = arith.addf %180, %179 : vector<2x128xf32>
    %182 = arith.divf %180, %181 : vector<2x128xf32>
    %183 = vector.extract_strided_slice %182 {offsets = [0, 32], sizes = [2, 32], strides = [1, 1]} : vector<2x128xf32> to vector<2x32xf32>
    %184 = arith.mulf %183, %149 : vector<2x32xf32>
    %185 = vector.extract_strided_slice %182 {offsets = [0, 0], sizes = [2, 32], strides = [1, 1]} : vector<2x128xf32> to vector<2x32xf32>
    %186 = vector.extract_strided_slice %177 {offsets = [0, 64], sizes = [2, 32], strides = [1, 1]} : vector<2x128xf32> to vector<2x32xf32>
    %187 = math.tanh %186 : vector<2x32xf32>
    %188 = arith.mulf %185, %187 : vector<2x32xf32>
    %189 = arith.addf %184, %188 : vector<2x32xf32>
    %190 = vector.extract_strided_slice %182 {offsets = [0, 96], sizes = [2, 32], strides = [1, 1]} : vector<2x128xf32> to vector<2x32xf32>
    %191 = math.tanh %189 : vector<2x32xf32>
    %192 = arith.mulf %190, %191 : vector<2x32xf32>
    %193 = vector.extract_strided_slice %64 {offsets = [6, 0], sizes = [2, 128], strides = [1, 1]} : vector<16x128xf32> to vector<2x128xf32>
    %c32_71 = arith.constant 32 : index
    %c0_72 = arith.constant 0 : index
    %194 = vector.load %arg3[%c32_71, %c0_72] : memref<336x128xf32, #tpu.memory_space<vmem>>, vector<32x128xf32>
    %cst_73 = arith.constant dense<0.000000e+00> : vector<2x128xf32>
    %195 = tpu.matmul %171, %194, %cst_73 {dimension_numbers = #tpu.dot_dimension_numbers<[1], [0], [0], [1], [0, 0, 1, 1], [], []>} : vector<2x32xf32>, vector<32x128xf32>, vector<2x128xf32> -> vector<2x128xf32>
    %196 = arith.addf %193, %195 : vector<2x128xf32>
    %197 = arith.negf %196 : vector<2x128xf32>
    %198 = math.exp %197 : vector<2x128xf32>
    %cst_74 = arith.constant 1.000000e+00 : f32
    %199 = vector.broadcast %cst_74 : f32 to vector<2x128xf32>
    %200 = arith.addf %199, %198 : vector<2x128xf32>
    %201 = arith.divf %199, %200 : vector<2x128xf32>
    %202 = vector.extract_strided_slice %201 {offsets = [0, 32], sizes = [2, 32], strides = [1, 1]} : vector<2x128xf32> to vector<2x32xf32>
    %203 = arith.mulf %202, %168 : vector<2x32xf32>
    %204 = vector.extract_strided_slice %201 {offsets = [0, 0], sizes = [2, 32], strides = [1, 1]} : vector<2x128xf32> to vector<2x32xf32>
    %205 = vector.extract_strided_slice %196 {offsets = [0, 64], sizes = [2, 32], strides = [1, 1]} : vector<2x128xf32> to vector<2x32xf32>
    %206 = math.tanh %205 : vector<2x32xf32>
    %207 = arith.mulf %204, %206 : vector<2x32xf32>
    %208 = arith.addf %203, %207 : vector<2x32xf32>
    %209 = vector.extract_strided_slice %201 {offsets = [0, 96], sizes = [2, 32], strides = [1, 1]} : vector<2x128xf32> to vector<2x32xf32>
    %210 = math.tanh %208 : vector<2x32xf32>
    %211 = arith.mulf %209, %210 : vector<2x32xf32>
    %212 = tpu.concatenate %211, %192 in 1 : vector<2x32xf32>, vector<2x32xf32> -> vector<2x64xf32>
    %c64_75 = arith.constant 64 : index
    %c0_76 = arith.constant 0 : index
    %213 = vector.load %arg3[%c64_75, %c0_76] : memref<336x128xf32, #tpu.memory_space<vmem>>, vector<64x128xf32>
    %cst_77 = arith.constant dense<0.000000e+00> : vector<2x128xf32>
    %214 = tpu.matmul %212, %213, %cst_77 {dimension_numbers = #tpu.dot_dimension_numbers<[1], [0], [0], [1], [0, 0, 1, 1], [], []>} : vector<2x64xf32>, vector<64x128xf32>, vector<2x128xf32> -> vector<2x128xf32>
    %c12_78 = arith.constant 12 : index
    %c0_79 = arith.constant 0 : index
    %215 = vector.load %arg4[%c12_78, %c0_79] : memref<16x128xf32, #tpu.memory_space<vmem>>, vector<1x128xf32>
    %216 = vector.broadcast %215 : vector<1x128xf32> to vector<2x128xf32>
    %217 = arith.addf %214, %216 : vector<2x128xf32>
    %218 = arith.negf %217 : vector<2x128xf32>
    %219 = math.exp %218 : vector<2x128xf32>
    %cst_80 = arith.constant 1.000000e+00 : f32
    %220 = vector.broadcast %cst_80 : f32 to vector<2x128xf32>
    %221 = arith.addf %220, %219 : vector<2x128xf32>
    %222 = arith.divf %220, %221 : vector<2x128xf32>
    %223 = vector.extract_strided_slice %222 {offsets = [0, 32], sizes = [2, 32], strides = [1, 1]} : vector<2x128xf32> to vector<2x32xf32>
    %224 = arith.mulf %223, %189 : vector<2x32xf32>
    %225 = vector.extract_strided_slice %222 {offsets = [0, 0], sizes = [2, 32], strides = [1, 1]} : vector<2x128xf32> to vector<2x32xf32>
    %226 = vector.extract_strided_slice %217 {offsets = [0, 64], sizes = [2, 32], strides = [1, 1]} : vector<2x128xf32> to vector<2x32xf32>
    %227 = math.tanh %226 : vector<2x32xf32>
    %228 = arith.mulf %225, %227 : vector<2x32xf32>
    %229 = arith.addf %224, %228 : vector<2x32xf32>
    %230 = vector.extract_strided_slice %222 {offsets = [0, 96], sizes = [2, 32], strides = [1, 1]} : vector<2x128xf32> to vector<2x32xf32>
    %231 = math.tanh %229 : vector<2x32xf32>
    %232 = arith.mulf %230, %231 : vector<2x32xf32>
    %233 = vector.extract_strided_slice %64 {offsets = [8, 0], sizes = [2, 128], strides = [1, 1]} : vector<16x128xf32> to vector<2x128xf32>
    %c32_81 = arith.constant 32 : index
    %c0_82 = arith.constant 0 : index
    %234 = vector.load %arg3[%c32_81, %c0_82] : memref<336x128xf32, #tpu.memory_space<vmem>>, vector<32x128xf32>
    %cst_83 = arith.constant dense<0.000000e+00> : vector<2x128xf32>
    %235 = tpu.matmul %211, %234, %cst_83 {dimension_numbers = #tpu.dot_dimension_numbers<[1], [0], [0], [1], [0, 0, 1, 1], [], []>} : vector<2x32xf32>, vector<32x128xf32>, vector<2x128xf32> -> vector<2x128xf32>
    %236 = arith.addf %233, %235 : vector<2x128xf32>
    %237 = arith.negf %236 : vector<2x128xf32>
    %238 = math.exp %237 : vector<2x128xf32>
    %cst_84 = arith.constant 1.000000e+00 : f32
    %239 = vector.broadcast %cst_84 : f32 to vector<2x128xf32>
    %240 = arith.addf %239, %238 : vector<2x128xf32>
    %241 = arith.divf %239, %240 : vector<2x128xf32>
    %242 = vector.extract_strided_slice %241 {offsets = [0, 32], sizes = [2, 32], strides = [1, 1]} : vector<2x128xf32> to vector<2x32xf32>
    %243 = arith.mulf %242, %208 : vector<2x32xf32>
    %244 = vector.extract_strided_slice %241 {offsets = [0, 0], sizes = [2, 32], strides = [1, 1]} : vector<2x128xf32> to vector<2x32xf32>
    %245 = vector.extract_strided_slice %236 {offsets = [0, 64], sizes = [2, 32], strides = [1, 1]} : vector<2x128xf32> to vector<2x32xf32>
    %246 = math.tanh %245 : vector<2x32xf32>
    %247 = arith.mulf %244, %246 : vector<2x32xf32>
    %248 = arith.addf %243, %247 : vector<2x32xf32>
    %249 = vector.extract_strided_slice %241 {offsets = [0, 96], sizes = [2, 32], strides = [1, 1]} : vector<2x128xf32> to vector<2x32xf32>
    %250 = math.tanh %248 : vector<2x32xf32>
    %251 = arith.mulf %249, %250 : vector<2x32xf32>
    %252 = tpu.concatenate %251, %232 in 1 : vector<2x32xf32>, vector<2x32xf32> -> vector<2x64xf32>
    %c64_85 = arith.constant 64 : index
    %c0_86 = arith.constant 0 : index
    %253 = vector.load %arg3[%c64_85, %c0_86] : memref<336x128xf32, #tpu.memory_space<vmem>>, vector<64x128xf32>
    %cst_87 = arith.constant dense<0.000000e+00> : vector<2x128xf32>
    %254 = tpu.matmul %252, %253, %cst_87 {dimension_numbers = #tpu.dot_dimension_numbers<[1], [0], [0], [1], [0, 0, 1, 1], [], []>} : vector<2x64xf32>, vector<64x128xf32>, vector<2x128xf32> -> vector<2x128xf32>
    %c12_88 = arith.constant 12 : index
    %c0_89 = arith.constant 0 : index
    %255 = vector.load %arg4[%c12_88, %c0_89] : memref<16x128xf32, #tpu.memory_space<vmem>>, vector<1x128xf32>
    %256 = vector.broadcast %255 : vector<1x128xf32> to vector<2x128xf32>
    %257 = arith.addf %254, %256 : vector<2x128xf32>
    %258 = arith.negf %257 : vector<2x128xf32>
    %259 = math.exp %258 : vector<2x128xf32>
    %cst_90 = arith.constant 1.000000e+00 : f32
    %260 = vector.broadcast %cst_90 : f32 to vector<2x128xf32>
    %261 = arith.addf %260, %259 : vector<2x128xf32>
    %262 = arith.divf %260, %261 : vector<2x128xf32>
    %263 = vector.extract_strided_slice %262 {offsets = [0, 32], sizes = [2, 32], strides = [1, 1]} : vector<2x128xf32> to vector<2x32xf32>
    %264 = arith.mulf %263, %229 : vector<2x32xf32>
    %265 = vector.extract_strided_slice %262 {offsets = [0, 0], sizes = [2, 32], strides = [1, 1]} : vector<2x128xf32> to vector<2x32xf32>
    %266 = vector.extract_strided_slice %257 {offsets = [0, 64], sizes = [2, 32], strides = [1, 1]} : vector<2x128xf32> to vector<2x32xf32>
    %267 = math.tanh %266 : vector<2x32xf32>
    %268 = arith.mulf %265, %267 : vector<2x32xf32>
    %269 = arith.addf %264, %268 : vector<2x32xf32>
    %270 = vector.extract_strided_slice %262 {offsets = [0, 96], sizes = [2, 32], strides = [1, 1]} : vector<2x128xf32> to vector<2x32xf32>
    %271 = math.tanh %269 : vector<2x32xf32>
    %272 = arith.mulf %270, %271 : vector<2x32xf32>
    %273 = vector.extract_strided_slice %64 {offsets = [10, 0], sizes = [2, 128], strides = [1, 1]} : vector<16x128xf32> to vector<2x128xf32>
    %c32_91 = arith.constant 32 : index
    %c0_92 = arith.constant 0 : index
    %274 = vector.load %arg3[%c32_91, %c0_92] : memref<336x128xf32, #tpu.memory_space<vmem>>, vector<32x128xf32>
    %cst_93 = arith.constant dense<0.000000e+00> : vector<2x128xf32>
    %275 = tpu.matmul %251, %274, %cst_93 {dimension_numbers = #tpu.dot_dimension_numbers<[1], [0], [0], [1], [0, 0, 1, 1], [], []>} : vector<2x32xf32>, vector<32x128xf32>, vector<2x128xf32> -> vector<2x128xf32>
    %276 = arith.addf %273, %275 : vector<2x128xf32>
    %277 = arith.negf %276 : vector<2x128xf32>
    %278 = math.exp %277 : vector<2x128xf32>
    %cst_94 = arith.constant 1.000000e+00 : f32
    %279 = vector.broadcast %cst_94 : f32 to vector<2x128xf32>
    %280 = arith.addf %279, %278 : vector<2x128xf32>
    %281 = arith.divf %279, %280 : vector<2x128xf32>
    %282 = vector.extract_strided_slice %281 {offsets = [0, 32], sizes = [2, 32], strides = [1, 1]} : vector<2x128xf32> to vector<2x32xf32>
    %283 = arith.mulf %282, %248 : vector<2x32xf32>
    %284 = vector.extract_strided_slice %281 {offsets = [0, 0], sizes = [2, 32], strides = [1, 1]} : vector<2x128xf32> to vector<2x32xf32>
    %285 = vector.extract_strided_slice %276 {offsets = [0, 64], sizes = [2, 32], strides = [1, 1]} : vector<2x128xf32> to vector<2x32xf32>
    %286 = math.tanh %285 : vector<2x32xf32>
    %287 = arith.mulf %284, %286 : vector<2x32xf32>
    %288 = arith.addf %283, %287 : vector<2x32xf32>
    %289 = vector.extract_strided_slice %281 {offsets = [0, 96], sizes = [2, 32], strides = [1, 1]} : vector<2x128xf32> to vector<2x32xf32>
    %290 = math.tanh %288 : vector<2x32xf32>
    %291 = arith.mulf %289, %290 : vector<2x32xf32>
    %292 = tpu.concatenate %291, %272 in 1 : vector<2x32xf32>, vector<2x32xf32> -> vector<2x64xf32>
    %c64_95 = arith.constant 64 : index
    %c0_96 = arith.constant 0 : index
    %293 = vector.load %arg3[%c64_95, %c0_96] : memref<336x128xf32, #tpu.memory_space<vmem>>, vector<64x128xf32>
    %cst_97 = arith.constant dense<0.000000e+00> : vector<2x128xf32>
    %294 = tpu.matmul %292, %293, %cst_97 {dimension_numbers = #tpu.dot_dimension_numbers<[1], [0], [0], [1], [0, 0, 1, 1], [], []>} : vector<2x64xf32>, vector<64x128xf32>, vector<2x128xf32> -> vector<2x128xf32>
    %c12_98 = arith.constant 12 : index
    %c0_99 = arith.constant 0 : index
    %295 = vector.load %arg4[%c12_98, %c0_99] : memref<16x128xf32, #tpu.memory_space<vmem>>, vector<1x128xf32>
    %296 = vector.broadcast %295 : vector<1x128xf32> to vector<2x128xf32>
    %297 = arith.addf %294, %296 : vector<2x128xf32>
    %298 = arith.negf %297 : vector<2x128xf32>
    %299 = math.exp %298 : vector<2x128xf32>
    %cst_100 = arith.constant 1.000000e+00 : f32
    %300 = vector.broadcast %cst_100 : f32 to vector<2x128xf32>
    %301 = arith.addf %300, %299 : vector<2x128xf32>
    %302 = arith.divf %300, %301 : vector<2x128xf32>
    %303 = vector.extract_strided_slice %302 {offsets = [0, 32], sizes = [2, 32], strides = [1, 1]} : vector<2x128xf32> to vector<2x32xf32>
    %304 = arith.mulf %303, %269 : vector<2x32xf32>
    %305 = vector.extract_strided_slice %302 {offsets = [0, 0], sizes = [2, 32], strides = [1, 1]} : vector<2x128xf32> to vector<2x32xf32>
    %306 = vector.extract_strided_slice %297 {offsets = [0, 64], sizes = [2, 32], strides = [1, 1]} : vector<2x128xf32> to vector<2x32xf32>
    %307 = math.tanh %306 : vector<2x32xf32>
    %308 = arith.mulf %305, %307 : vector<2x32xf32>
    %309 = arith.addf %304, %308 : vector<2x32xf32>
    %310 = vector.extract_strided_slice %302 {offsets = [0, 96], sizes = [2, 32], strides = [1, 1]} : vector<2x128xf32> to vector<2x32xf32>
    %311 = math.tanh %309 : vector<2x32xf32>
    %312 = arith.mulf %310, %311 : vector<2x32xf32>
    %313 = vector.extract_strided_slice %64 {offsets = [12, 0], sizes = [2, 128], strides = [1, 1]} : vector<16x128xf32> to vector<2x128xf32>
    %c32_101 = arith.constant 32 : index
    %c0_102 = arith.constant 0 : index
    %314 = vector.load %arg3[%c32_101, %c0_102] : memref<336x128xf32, #tpu.memory_space<vmem>>, vector<32x128xf32>
    %cst_103 = arith.constant dense<0.000000e+00> : vector<2x128xf32>
    %315 = tpu.matmul %291, %314, %cst_103 {dimension_numbers = #tpu.dot_dimension_numbers<[1], [0], [0], [1], [0, 0, 1, 1], [], []>} : vector<2x32xf32>, vector<32x128xf32>, vector<2x128xf32> -> vector<2x128xf32>
    %316 = arith.addf %313, %315 : vector<2x128xf32>
    %317 = arith.negf %316 : vector<2x128xf32>
    %318 = math.exp %317 : vector<2x128xf32>
    %cst_104 = arith.constant 1.000000e+00 : f32
    %319 = vector.broadcast %cst_104 : f32 to vector<2x128xf32>
    %320 = arith.addf %319, %318 : vector<2x128xf32>
    %321 = arith.divf %319, %320 : vector<2x128xf32>
    %322 = vector.extract_strided_slice %321 {offsets = [0, 32], sizes = [2, 32], strides = [1, 1]} : vector<2x128xf32> to vector<2x32xf32>
    %323 = arith.mulf %322, %288 : vector<2x32xf32>
    %324 = vector.extract_strided_slice %321 {offsets = [0, 0], sizes = [2, 32], strides = [1, 1]} : vector<2x128xf32> to vector<2x32xf32>
    %325 = vector.extract_strided_slice %316 {offsets = [0, 64], sizes = [2, 32], strides = [1, 1]} : vector<2x128xf32> to vector<2x32xf32>
    %326 = math.tanh %325 : vector<2x32xf32>
    %327 = arith.mulf %324, %326 : vector<2x32xf32>
    %328 = arith.addf %323, %327 : vector<2x32xf32>
    %329 = vector.extract_strided_slice %321 {offsets = [0, 96], sizes = [2, 32], strides = [1, 1]} : vector<2x128xf32> to vector<2x32xf32>
    %330 = math.tanh %328 : vector<2x32xf32>
    %331 = arith.mulf %329, %330 : vector<2x32xf32>
    %332 = tpu.concatenate %331, %312 in 1 : vector<2x32xf32>, vector<2x32xf32> -> vector<2x64xf32>
    %c64_105 = arith.constant 64 : index
    %c0_106 = arith.constant 0 : index
    %333 = vector.load %arg3[%c64_105, %c0_106] : memref<336x128xf32, #tpu.memory_space<vmem>>, vector<64x128xf32>
    %cst_107 = arith.constant dense<0.000000e+00> : vector<2x128xf32>
    %334 = tpu.matmul %332, %333, %cst_107 {dimension_numbers = #tpu.dot_dimension_numbers<[1], [0], [0], [1], [0, 0, 1, 1], [], []>} : vector<2x64xf32>, vector<64x128xf32>, vector<2x128xf32> -> vector<2x128xf32>
    %c12_108 = arith.constant 12 : index
    %c0_109 = arith.constant 0 : index
    %335 = vector.load %arg4[%c12_108, %c0_109] : memref<16x128xf32, #tpu.memory_space<vmem>>, vector<1x128xf32>
    %336 = vector.broadcast %335 : vector<1x128xf32> to vector<2x128xf32>
    %337 = arith.addf %334, %336 : vector<2x128xf32>
    %338 = arith.negf %337 : vector<2x128xf32>
    %339 = math.exp %338 : vector<2x128xf32>
    %cst_110 = arith.constant 1.000000e+00 : f32
    %340 = vector.broadcast %cst_110 : f32 to vector<2x128xf32>
    %341 = arith.addf %340, %339 : vector<2x128xf32>
    %342 = arith.divf %340, %341 : vector<2x128xf32>
    %343 = vector.extract_strided_slice %342 {offsets = [0, 32], sizes = [2, 32], strides = [1, 1]} : vector<2x128xf32> to vector<2x32xf32>
    %344 = arith.mulf %343, %309 : vector<2x32xf32>
    %345 = vector.extract_strided_slice %342 {offsets = [0, 0], sizes = [2, 32], strides = [1, 1]} : vector<2x128xf32> to vector<2x32xf32>
    %346 = vector.extract_strided_slice %337 {offsets = [0, 64], sizes = [2, 32], strides = [1, 1]} : vector<2x128xf32> to vector<2x32xf32>
    %347 = math.tanh %346 : vector<2x32xf32>
    %348 = arith.mulf %345, %347 : vector<2x32xf32>
    %349 = arith.addf %344, %348 : vector<2x32xf32>
    %350 = vector.extract_strided_slice %342 {offsets = [0, 96], sizes = [2, 32], strides = [1, 1]} : vector<2x128xf32> to vector<2x32xf32>
    %351 = math.tanh %349 : vector<2x32xf32>
    %352 = arith.mulf %350, %351 : vector<2x32xf32>
    %353 = vector.extract_strided_slice %64 {offsets = [14, 0], sizes = [2, 128], strides = [1, 1]} : vector<16x128xf32> to vector<2x128xf32>
    %c32_111 = arith.constant 32 : index
    %c0_112 = arith.constant 0 : index
    %354 = vector.load %arg3[%c32_111, %c0_112] : memref<336x128xf32, #tpu.memory_space<vmem>>, vector<32x128xf32>
    %cst_113 = arith.constant dense<0.000000e+00> : vector<2x128xf32>
    %355 = tpu.matmul %331, %354, %cst_113 {dimension_numbers = #tpu.dot_dimension_numbers<[1], [0], [0], [1], [0, 0, 1, 1], [], []>} : vector<2x32xf32>, vector<32x128xf32>, vector<2x128xf32> -> vector<2x128xf32>
    %356 = arith.addf %353, %355 : vector<2x128xf32>
    %357 = arith.negf %356 : vector<2x128xf32>
    %358 = math.exp %357 : vector<2x128xf32>
    %cst_114 = arith.constant 1.000000e+00 : f32
    %359 = vector.broadcast %cst_114 : f32 to vector<2x128xf32>
    %360 = arith.addf %359, %358 : vector<2x128xf32>
    %361 = arith.divf %359, %360 : vector<2x128xf32>
    %362 = vector.extract_strided_slice %361 {offsets = [0, 32], sizes = [2, 32], strides = [1, 1]} : vector<2x128xf32> to vector<2x32xf32>
    %363 = arith.mulf %362, %328 : vector<2x32xf32>
    %364 = vector.extract_strided_slice %361 {offsets = [0, 0], sizes = [2, 32], strides = [1, 1]} : vector<2x128xf32> to vector<2x32xf32>
    %365 = vector.extract_strided_slice %356 {offsets = [0, 64], sizes = [2, 32], strides = [1, 1]} : vector<2x128xf32> to vector<2x32xf32>
    %366 = math.tanh %365 : vector<2x32xf32>
    %367 = arith.mulf %364, %366 : vector<2x32xf32>
    %368 = arith.addf %363, %367 : vector<2x32xf32>
    %369 = vector.extract_strided_slice %361 {offsets = [0, 96], sizes = [2, 32], strides = [1, 1]} : vector<2x128xf32> to vector<2x32xf32>
    %370 = math.tanh %368 : vector<2x32xf32>
    %371 = arith.mulf %369, %370 : vector<2x32xf32>
    %372 = tpu.concatenate %371, %352 in 1 : vector<2x32xf32>, vector<2x32xf32> -> vector<2x64xf32>
    %c64_115 = arith.constant 64 : index
    %c0_116 = arith.constant 0 : index
    %373 = vector.load %arg3[%c64_115, %c0_116] : memref<336x128xf32, #tpu.memory_space<vmem>>, vector<64x128xf32>
    %cst_117 = arith.constant dense<0.000000e+00> : vector<2x128xf32>
    %374 = tpu.matmul %372, %373, %cst_117 {dimension_numbers = #tpu.dot_dimension_numbers<[1], [0], [0], [1], [0, 0, 1, 1], [], []>} : vector<2x64xf32>, vector<64x128xf32>, vector<2x128xf32> -> vector<2x128xf32>
    %c12_118 = arith.constant 12 : index
    %c0_119 = arith.constant 0 : index
    %375 = vector.load %arg4[%c12_118, %c0_119] : memref<16x128xf32, #tpu.memory_space<vmem>>, vector<1x128xf32>
    %376 = vector.broadcast %375 : vector<1x128xf32> to vector<2x128xf32>
    %377 = arith.addf %374, %376 : vector<2x128xf32>
    %378 = arith.negf %377 : vector<2x128xf32>
    %379 = math.exp %378 : vector<2x128xf32>
    %cst_120 = arith.constant 1.000000e+00 : f32
    %380 = vector.broadcast %cst_120 : f32 to vector<2x128xf32>
    %381 = arith.addf %380, %379 : vector<2x128xf32>
    %382 = arith.divf %380, %381 : vector<2x128xf32>
    %383 = vector.extract_strided_slice %382 {offsets = [0, 32], sizes = [2, 32], strides = [1, 1]} : vector<2x128xf32> to vector<2x32xf32>
    %384 = arith.mulf %383, %349 : vector<2x32xf32>
    %385 = vector.extract_strided_slice %382 {offsets = [0, 0], sizes = [2, 32], strides = [1, 1]} : vector<2x128xf32> to vector<2x32xf32>
    %386 = vector.extract_strided_slice %377 {offsets = [0, 64], sizes = [2, 32], strides = [1, 1]} : vector<2x128xf32> to vector<2x32xf32>
    %387 = math.tanh %386 : vector<2x32xf32>
    %388 = arith.mulf %385, %387 : vector<2x32xf32>
    %389 = arith.addf %384, %388 : vector<2x32xf32>
    %390 = vector.extract_strided_slice %382 {offsets = [0, 96], sizes = [2, 32], strides = [1, 1]} : vector<2x128xf32> to vector<2x32xf32>
    %391 = math.tanh %389 : vector<2x32xf32>
    %392 = arith.mulf %390, %391 : vector<2x32xf32>
    %393 = tpu.concatenate %112, %152, %192, %232, %272, %312, %352, %392 in 0 : vector<2x32xf32>, vector<2x32xf32>, vector<2x32xf32>, vector<2x32xf32>, vector<2x32xf32>, vector<2x32xf32>, vector<2x32xf32>, vector<2x32xf32> -> vector<16x32xf32>
    %c7 = arith.constant 7 : index
    %c0_121 = arith.constant 0 : index
    %394 = vector.load %arg4[%c7, %c0_121] : memref<16x128xf32, #tpu.memory_space<vmem>>, vector<1x32xf32>
    %c8 = arith.constant 8 : index
    %c0_122 = arith.constant 0 : index
    %395 = vector.load %arg4[%c8, %c0_122] : memref<16x128xf32, #tpu.memory_space<vmem>>, vector<1x32xf32>
    %cst_123 = arith.constant dense<0.000000e+00> : vector<16xf32>
    %396 = vector.multi_reduction <add>, %393, %cst_123 [1] : vector<16x32xf32> to vector<16xf32>
    %397 = vector.shape_cast %396 : vector<16xf32> to vector<16x1xf32>
    %cst_124 = arith.constant 3.200000e+01 : f32
    %398 = vector.broadcast %cst_124 : f32 to vector<16x1xf32>
    %399 = arith.divf %397, %398 : vector<16x1xf32>
    %400 = vector.broadcast %399 : vector<16x1xf32> to vector<16x32xf32>
    %401 = arith.subf %393, %400 : vector<16x32xf32>
    %402 = arith.mulf %401, %401 : vector<16x32xf32>
    %cst_125 = arith.constant dense<0.000000e+00> : vector<16xf32>
    %403 = vector.multi_reduction <add>, %402, %cst_125 [1] : vector<16x32xf32> to vector<16xf32>
    %404 = vector.shape_cast %403 : vector<16xf32> to vector<16x1xf32>
    %cst_126 = arith.constant 3.200000e+01 : f32
    %405 = vector.broadcast %cst_126 : f32 to vector<16x1xf32>
    %406 = arith.divf %404, %405 : vector<16x1xf32>
    %407 = vector.broadcast %399 : vector<16x1xf32> to vector<16x32xf32>
    %408 = arith.subf %393, %407 : vector<16x32xf32>
    %cst_127 = arith.constant 9.99999974E-6 : f32
    %409 = vector.broadcast %cst_127 : f32 to vector<16x1xf32>
    %410 = arith.addf %406, %409 : vector<16x1xf32>
    %411 = math.rsqrt %410 : vector<16x1xf32>
    %412 = vector.broadcast %411 : vector<16x1xf32> to vector<16x32xf32>
    %413 = arith.mulf %408, %412 : vector<16x32xf32>
    %414 = vector.broadcast %394 : vector<1x32xf32> to vector<16x32xf32>
    %415 = arith.mulf %413, %414 : vector<16x32xf32>
    %416 = vector.broadcast %395 : vector<1x32xf32> to vector<16x32xf32>
    %417 = arith.addf %415, %416 : vector<16x32xf32>
    %c272 = arith.constant 272 : index
    %c0_128 = arith.constant 0 : index
    %418 = vector.load %arg3[%c272, %c0_128] : memref<336x128xf32, #tpu.memory_space<vmem>>, vector<32x32xf32>
    %cst_129 = arith.constant dense<0.000000e+00> : vector<16x32xf32>
    %419 = tpu.matmul %417, %418, %cst_129 {dimension_numbers = #tpu.dot_dimension_numbers<[1], [0], [0], [1], [0, 0, 1, 1], [], []>} : vector<16x32xf32>, vector<32x32xf32>, vector<16x32xf32> -> vector<16x32xf32>
    %c9 = arith.constant 9 : index
    %c0_130 = arith.constant 0 : index
    %420 = vector.load %arg4[%c9, %c0_130] : memref<16x128xf32, #tpu.memory_space<vmem>>, vector<1x32xf32>
    %421 = vector.broadcast %420 : vector<1x32xf32> to vector<16x32xf32>
    %422 = arith.addf %419, %421 : vector<16x32xf32>
    %cst_131 = arith.constant 0.000000e+00 : f32
    %423 = vector.broadcast %cst_131 : f32 to vector<16x32xf32>
    %424 = arith.maximumf %422, %423 : vector<16x32xf32>
    %c304 = arith.constant 304 : index
    %c0_132 = arith.constant 0 : index
    %425 = vector.load %arg3[%c304, %c0_132] : memref<336x128xf32, #tpu.memory_space<vmem>>, vector<32x32xf32>
    %cst_133 = arith.constant dense<0.000000e+00> : vector<16x32xf32>
    %426 = tpu.matmul %424, %425, %cst_133 {dimension_numbers = #tpu.dot_dimension_numbers<[1], [0], [0], [1], [0, 0, 1, 1], [], []>} : vector<16x32xf32>, vector<32x32xf32>, vector<16x32xf32> -> vector<16x32xf32>
    %c10 = arith.constant 10 : index
    %c0_134 = arith.constant 0 : index
    %427 = vector.load %arg4[%c10, %c0_134] : memref<16x128xf32, #tpu.memory_space<vmem>>, vector<1x32xf32>
    %428 = vector.broadcast %427 : vector<1x32xf32> to vector<16x32xf32>
    %429 = arith.addf %426, %428 : vector<16x32xf32>
    %430 = math.tanh %429 : vector<16x32xf32>
    %431 = tpu.concatenate %371, %392, %368, %389 in 0 : vector<2x32xf32>, vector<2x32xf32>, vector<2x32xf32>, vector<2x32xf32> -> vector<8x32xf32>
    %cst_135 = arith.constant 0.000000e+00 : f32
    %432 = vector.broadcast %cst_135 : f32 to vector<8x32xf32>
    %433 = tpu.concatenate %431, %432 in 0 : vector<8x32xf32>, vector<8x32xf32> -> vector<16x32xf32>
    %cst_136 = arith.constant 0.000000e+00 : f32
    %434 = vector.broadcast %cst_136 : f32 to vector<16x64xf32>
    %435 = tpu.concatenate %430, %433, %434 in 1 : vector<16x32xf32>, vector<16x32xf32>, vector<16x64xf32> -> vector<16x128xf32>
    %c0_137 = arith.constant 0 : index
    %c0_138 = arith.constant 0 : index
    %436 = vector.load %arg5[%c0_137, %c0_138] : memref<16x128xf32, #tpu.memory_space<vmem>>, vector<16x128xf32>
    tpu.vector_store %arg5[%c0_137, %c0_138], %435 {strides = array<i32>} : memref<16x128xf32, #tpu.memory_space<vmem>>, vector<16x128xf32>,
    return
  }
}

</mosaic_0001>

<bundles_post_ra>
// kernel: fclstm_forward.1
= control target key start
LH: loop header
LB: loop body
LE: loop exit
PB: predicated region body
PF: predicated region fallthrough
CT: control target
= control target key end

     0   :  { %10 = vsyncpa [#allocation3], 0  ;;  %s3388_s18 = smov [#allocation2]   ;;  %s3988_s0 = inlined_call_operand.vmem [shape: f32[16,16], index: 0, kind: input, shape index: {}]   ;;  %s3989_s1 = inlined_call_operand.vmem [shape: f32[2,2,32], index: 1, kind: input, shape index: {}]   ;;  %s3990_s2 = inlined_call_operand.vmem [shape: f32[2,2,32], index: 2, kind: input, shape index: {}]   ;;  %s3991_s3 = inlined_call_operand.hbm [shape: f32[336,128], index: 3, kind: input, shape index: {}]   ;;  %s3992_s4 = inlined_call_operand.vmem [shape: f32[16,128], index: 4, kind: input, shape index: {}]   ;;  %s3993_s5 = inlined_call_operand.vmem [shape: f32[16,128], index: 5, kind: output, shape index: {}]  }
   0x1   :  { %s22_s19 = sshll.u32 %s3388_s18, 4  ;;  %s23_s19 = int_to_ptr.vmem [resolvable:$true] %s22_s19 }
   0x2   :  { %s3374_s20 = scalar_lea.vmem %s23_s19, 5376  ;;  %p3379_p1 = scmp.lt.s32.totalorder %s23_s19, %s23_s19 }
   0x3   :  { %p3375_p0 = scmp.ne.s32.totalorder %s23_s19, %s3374_s20  ;;  %p3380_p2 = scmp.lt.s32.totalorder %s3374_s20, %s3374_s20 }
   0x5   :  { %p3381_p3 = por %p3380_p2, %p3379_p1 }
   0x7   :  { %p3382_p4 = pnand %p3381_p3, %p3375_p0 }
   0x9   :  { %3385 = shalt.err (!%p3382_p4)
}
   0xa   :  { %s3389_s21 = smov 128   ;;  %s3390_s22 = smov 8  }
   0xb   :  { %28 = dma.hbm_to_vmem [thread:$0]  %s3991_s3, 5376, %s23_s19, [#allocation3], %s3389_s21, %s3389_s21, %s3390_s22  }
   0xc   :  { %3386 = dma.done.wait [#allocation3], 5376  }
   0xd   :  { %3387 = vsyncadd [#allocation3], 4294961920  ;;  %vm43_vm0 = vcmask 130048   ;;  %v37_v0 = vld [vmem:[#allocation2 + $0x88] sm:$0xff]  ;;  %v36_v1 = vld [vmem:[#allocation2 + $0x80] sm:$0xff]  ;;  %vm136_vm1 = vcmask 261120  }
   0xe   :  { %v34_v2 = vld [vmem:[%s3988_s0] sm:$0xff]  ;;  %2881 = vmatprep.subr.mxu0 %v37_v0  ;;  %v35_v3 = vld [vmem:[%s3988_s0 + $0x8] sm:$0xff]  ;;  %v128_v6 = vld [vmem:[#allocation2 + $0x98] sm:$0xff]  ;;  %vm3392_vm2 = vmmov 0   ;;  %s3393_s16 = smov 32   ;;  %s3394_s23 = smov 64  }
   0xf   :  { %2885 = vmatprep.mubr.msk.f32.mxu0 %vm43_vm0, %v34_v2  ;;  %2882 = vmatpush3.msra.mxu0 %v37_v0  ;;  %v130_v4 = vld [vmem:[#allocation2 + $0xa8] sm:$0xff]  ;;  %v129_v5 = vld [vmem:[#allocation2 + $0xa0] sm:$0xff]  ;;  %v127_v7 = vld [vmem:[#allocation2 + $0x90] sm:$0xff]  ;;  %vm761_vm3 = vcmask 523264   ;;  %vm2363_vm4 = vcmask 1041408   ;;  %vm2365_vm5 = vcmask 1043456  }
  0x10   :  { %2883 = vmatprep.subr.mxu0 %v36_v1  ;;  %2888 = vmatprep.subr.mxu1 %v130_v4  ;;  %v2660_v8 = vld [vmem:[%s3992_s4] ss:$0 sm:$0xff]  ;;  %v223_v15 = vld [vmem:[#allocation2 + $0xc8] sm:$0xff]  ;;  %v221_v17 = vld [vmem:[#allocation2 + $0xb8] sm:$0xff]  ;;  %vm2367_vm6 = vcmask 1045504   ;;  %s3395_s30 = smov 96  }
  0x11   :  { %2884 = vmatpush3.msra.mxu0 %v36_v1  ;;  %2889 = vmatpush3.msra.mxu1 %v130_v4  ;;  %v222_v16 = vld [vmem:[#allocation2 + $0xc0] sm:$0xff]  ;;  %v220_v18 = vld [vmem:[#allocation2 + $0xb0] sm:$0xff]  ;;  %v315_v26 = vld [vmem:[#allocation2 + $0xe8] sm:$0xff] }
  0x12   :  { %2886 = vmatmul.mubr.msk.f32.vlgmr.msra.gmra.mxu0 %vm43_vm0, %v35_v3  ;;  %2890 = vmatprep.subr.mxu1 %v129_v5  ;;  %v2663_v19 = vld [vmem:[%s3992_s4 + $0x1] ss:$0 sm:$0xff]  ;;  %v313_v28 = vld [vmem:[#allocation2 + $0xd8] sm:$0xff]  ;;  %v312_v29 = vld [vmem:[#allocation2 + $0xd0] sm:$0xff] }
  0x13   :  { %2891 = vmatpush3.msra.mxu1 %v129_v5  ;;  %2899 = vmatprep.subr.mxu0 %v223_v15  ;;  %v314_v27 = vld [vmem:[#allocation2 + $0xe0] sm:$0xff]  ;;  %v407_v37 = vld [vmem:[#allocation2 + $0x108] sm:$0xff]  ;;  %v405_v39 = vld [vmem:[#allocation2 + $0xf8] sm:$0xff] }
  0x14   :  { %2892 = vmatprep.subr.mxu1 %v128_v6  ;;  %2900 = vmatpush3.msra.mxu0 %v223_v15  ;;  %v2666_v30 = vld [vmem:[%s3992_s4 + $0x2] ss:$0 sm:$0xff]  ;;  %v404_v40 = vld [vmem:[#allocation2 + $0xf0] sm:$0xff]  ;;  %v2669_v41 = vld [vmem:[%s3992_s4 + $0x3] ss:$0 sm:$0xff] }
  0x15   :  { %2893 = vmatpush3.msra.mxu1 %v128_v6  ;;  %2901 = vmatprep.subr.mxu0 %v222_v16  ;;  %v406_v38 = vld [vmem:[#allocation2 + $0x100] sm:$0xff]  ;;  %v540_v3 = vld [vmem:[#allocation2 + $0x18] sm:$0xff]  ;;  %v539_v4 = vld [vmem:[#allocation2 + $0x10] sm:$0xff]  ;;  %v3391_v6 = vmov 0.0  }
  0x16   :  { %2894 = vmatprep.subr.mxu1 %v127_v7  ;;  %2902 = vmatpush3.msra.mxu0 %v222_v16  ;;  %v2672_v49 = vld [vmem:[%s3992_s4 + $0x4] ss:$0 sm:$0xff]  ;;  %v3470_v5 = vld [vmem:[#allocation2 + $0x38] sm:$0xff] }
  0x17   :  { %2895 = vmatpush3.msra.mxu1 %v127_v7  ;;  %2903 = vmatprep.subr.mxu0 %v221_v17  ;;  %v538_v7 = vld [vmem:[#allocation2 + $0x8] sm:$0xff] }
  0x18   :  { %2904 = vmatpush3.msra.mxu0 %v221_v17  ;;  %2910 = vmatprep.subr.mxu1 %v315_v26 }
  0x19   :  { %2905 = vmatprep.subr.mxu0 %v220_v18 }
  0x1a   :  { %2906 = vmatpush3.msra.mxu0 %v220_v18 }
  0x1b   :  { %2921 = vmatprep.subr.mxu0 %v407_v37 }
  0xd2   :  { %v2887_v9 = vpop.f32.mrf.mxu0 }
  0xd3   :  { %v122_v10 = vadd.f32 %v2887_v9, %v2660_v8  ;;  %v537_v9 = vld [vmem:[#allocation2] sm:$0xff] }
  0xd4   :  { %v116_v11 = vpop.f32.mrf.mxu0 }
  0xd5   :  { %v117_v12 = vadd.f32 %v2660_v8, %v116_v11  ;;  %v126_v14 = vmax.f32 %v122_v10, 0.0  ;;  %v3475_v8 = vld [vmem:[#allocation2 + $0x30] sm:$0xff]  ;;  %v3479_v10 = vld [vmem:[#allocation2 + $0x28] sm:$0xff]  ;;  %v3483_v11 = vld [vmem:[#allocation2 + $0x20] sm:$0xff] }
  0xd7   :  { %v125_v13 = vmax.f32 %v117_v12, 0.0  ;;  %v627_v12 = vld [vmem:[%s3989_s1] sm:$0x3] }
  0xd9   :  { %2896 = vmatprep.mubr.msk.f32.mxu1 %vm136_vm1, %v125_v13  ;;  %v630_v13 = vld [vmem:[%s3990_s2] sm:$0x3] }
  0xda   :  { %2897 = vmatmul.mubr.msk.f32.vlgmr.msra.gmra.mxu1 %vm136_vm1, %v126_v14 }
  0xdb   :  { %2911 = vmatpush3.msra.mxu1 %v315_v26 }
  0xdc   :  { %2912 = vmatprep.subr.mxu1 %v314_v27 }
  0xdd   :  { %2913 = vmatpush3.msra.mxu1 %v314_v27 }
  0xde   :  { %2914 = vmatprep.subr.mxu1 %v313_v28 }
  0xdf   :  { %2915 = vmatpush3.msra.mxu1 %v313_v28 }
  0xe0   :  { %2916 = vmatprep.subr.mxu1 %v312_v29 }
  0xe1   :  { %2917 = vmatpush3.msra.mxu1 %v312_v29 }
  0xe2   :  { %2932 = vmatprep.subr.mxu1 %v540_v3 }
 0x19a   :  { %v2898_v20 = vpop.f32.mrf.mxu1 }
 0x19b   :  { %v215_v21 = vadd.f32 %v2898_v20, %v2663_v19 }
 0x19c   :  { %v209_v22 = vpop.f32.mrf.mxu1 }
 0x19d   :  { %v210_v23 = vadd.f32 %v2663_v19, %v209_v22  ;;  %v219_v25 = vmax.f32 %v215_v21, 0.0  ;;  %v2675_v21 = vld [vmem:[%s3992_s4 + $0x5] ss:$0 sm:$0xff] }
 0x19f   :  { %v218_v24 = vmax.f32 %v210_v23, 0.0  ;;  %v2676_v23 = vld [vmem:[%s3992_s4 + $0x6] ss:$0 sm:$0xff] }
 0x1a1   :  { %2907 = vmatprep.mubr.msk.f32.mxu0 %vm136_vm1, %v218_v24 }
 0x1a2   :  { %2908 = vmatmul.mubr.msk.f32.vlgmr.msra.gmra.mxu0 %vm136_vm1, %v219_v25 }
 0x1a3   :  { %2922 = vmatpush3.msra.mxu0 %v407_v37 }
 0x1a4   :  { %2923 = vmatprep.subr.mxu0 %v406_v38 }
 0x1a5   :  { %2924 = vmatpush3.msra.mxu0 %v406_v38 }
 0x1a6   :  { %2925 = vmatprep.subr.mxu0 %v405_v39 }
 0x1a7   :  { %2926 = vmatpush3.msra.mxu0 %v405_v39 }
 0x1a8   :  { %2927 = vmatprep.subr.mxu0 %v404_v40 }
 0x1a9   :  { %2928 = vmatpush3.msra.mxu0 %v404_v40 }
 0x1aa   :  { %2943 = vmatprep.subr.mxu0 %v3391_v6 }
 0x262   :  { %v2909_v31 = vpop.f32.mrf.mxu0 }
 0x263   :  { %v307_v32 = vadd.f32 %v2909_v31, %v2666_v30 }
 0x264   :  { %v301_v33 = vpop.f32.mrf.mxu0 }
 0x265   :  { %v302_v34 = vadd.f32 %v2666_v30, %v301_v33  ;;  %v311_v36 = vmax.f32 %v307_v32, 0.0  ;;  %v2677_v32 = vld [vmem:[%s3992_s4 + $0xb] ss:$0 sm:$0xff] }
 0x267   :  { %v310_v35 = vmax.f32 %v302_v34, 0.0 }
 0x269   :  { %2918 = vmatprep.mubr.msk.f32.mxu1 %vm136_vm1, %v310_v35 }
 0x26a   :  { %2919 = vmatmul.mubr.msk.f32.vlgmr.msra.gmra.mxu1 %vm136_vm1, %v311_v36 }
 0x26b   :  { %2933 = vmatpush3.msra.mxu1 %v540_v3 }
 0x26c   :  { %2934 = vmatprep.subr.mxu1 %v539_v4 }
 0x26d   :  { %2935 = vmatpush3.msra.mxu1 %v539_v4 }
 0x26e   :  { %2936 = vmatprep.subr.mxu1 %v538_v7 }
 0x26f   :  { %2937 = vmatpush3.msra.mxu1 %v538_v7 }
 0x270   :  { %2938 = vmatprep.subr.mxu1 %v537_v9 }
 0x271   :  { %2939 = vmatpush3.msra.mxu1 %v537_v9 }
 0x272   :  { %2954 = vmatprep.subr.mxu1 %v3391_v6 }
 0x32a   :  { %v2920_v42 = vpop.f32.mrf.mxu1 }
 0x32b   :  { %v399_v43 = vadd.f32 %v2920_v42, %v2669_v41 }
 0x32c   :  { %v393_v44 = vpop.f32.mrf.mxu1 }
 0x32d   :  { %v394_v45 = vadd.f32 %v2669_v41, %v393_v44  ;;  %v403_v47 = vmax.f32 %v399_v43, 0.0 }
 0x32f   :  { %v402_v46 = vmax.f32 %v394_v45, 0.0 }
 0x331   :  { %2929 = vmatprep.mubr.msk.f32.mxu0 %vm136_vm1, %v402_v46 }
 0x332   :  { %2930 = vmatmul.mubr.msk.f32.vlgmr.msra.gmra.mxu0 %vm136_vm1, %v403_v47 }
 0x333   :  { %2944 = vmatpush3.msra.mxu0 %v3470_v5  ;;  %2951 = vmatprep.mubr.msk.f32.mxu0 %vm3392_vm2, %v3391_v6 }
 0x334   :  { %2945 = vmatprep.subr.mxu0 %v3391_v6 }
 0x335   :  { %2946 = vmatpush3.msra.mxu0 %v3475_v8 }
 0x336   :  { %2947 = vmatprep.subr.mxu0 %v3391_v6 }
 0x337   :  { %2948 = vmatpush3.msra.mxu0 %v3479_v10 }
 0x338   :  { %2949 = vmatprep.subr.mxu0 %v3391_v6 }
 0x339   :  { %2950 = vmatpush3.msra.mxu0 %v3483_v11 }
 0x33a   :  { %2952 = vmatmul.mubr.msk.f32.vlgmr.msra.gmra.mxu0 %vm136_vm1, %v627_v12  ;;  %2973 = vmatprep.subr.mxu0 %v3391_v6 }
 0x33b   :  { %2981 = vmatprep.mubr.msk.f32.mxu0 %vm3392_vm2, %v3391_v6  ;;  %2974 = vmatpush3.msra.mxu0 %v3470_v5 }
 0x33c   :  { %2975 = vmatprep.subr.mxu0 %v3391_v6 }
 0x33d   :  { %2976 = vmatpush3.msra.mxu0 %v3475_v8 }
 0x33e   :  { %2977 = vmatprep.subr.mxu0 %v3391_v6 }
 0x33f   :  { %2978 = vmatpush3.msra.mxu0 %v3479_v10 }
 0x340   :  { %2979 = vmatprep.subr.mxu0 %v3391_v6 }
 0x341   :  { %2980 = vmatpush3.msra.mxu0 %v3483_v11 }
 0x342   :  { %2984 = vmatprep.subr.mxu0 %v3391_v6 }
 0x3f2   :  { %v2931_v48 = vpop.f32.mrf.mxu0 }
 0x3f3   :  { %v491_v51 = vadd.f32 %v2931_v48, %v2672_v49 }
 0x3f4   :  { %v485_v50 = vpop.f32.mrf.mxu0 }
 0x3f5   :  { %v486_v52 = vadd.f32 %v2672_v49, %v485_v50  ;;  %v495_v54 = vmax.f32 %v491_v51, 0.0  ;;  %v3533_v49 = vld [vmem:[#allocation2 + $0x78] sm:$0xff]  ;;  %v3535_v50 = vld [vmem:[#allocation2 + $0x70] sm:$0xff]  ;;  %v3539_v51 = vld [vmem:[#allocation2 + $0x68] sm:$0xff] }
 0x3f7   :  { %v494_v53 = vmax.f32 %v486_v52, 0.0  ;;  %v501_v56 = vsel %vm136_vm1, %v495_v54, 0.0  ;;  %v3543_v52 = vld [vmem:[#allocation2 + $0x60] sm:$0xff] }
 0x3f9   :  { %v498_v55 = vsel %vm136_vm1, %v494_v53, 0.0 }
 0x3fa   :  { %499 = vadd.xlane.f32.xlu0 %v498_v55  ;;  %v706_v30 = vpop.f32.mrf.mxu0 }
 0x3fc   :  { %v2953_v31 = vpop.f32.mrf.mxu0 }
 0x3fe   :  { %502 = vadd.xlane.f32.xlu0 %v501_v56  ;;  %v3555_v56 = vld [vmem:[#allocation2 + $0x48] sm:$0xff] }
 0x483   :  { %v500_v57 = vpop.xlane.xlu0 %499 }
 0x484   :  { %v505_v58 = vmul.f32 0.03125, %v500_v57  ;;  %v2680_v57 = vld [vmem:[%s3989_s1 + $0x2] sm:$0x3] }
 0x486   :  { %v3460_v59 = vsub.f32 %v494_v53, %v505_v58  ;;  %v3547_v53 = vld [vmem:[#allocation2 + $0x58] sm:$0xff]  ;;  %v3566_v58 = vld [vmem:[#allocation2 + $0x40] sm:$0xff] }
 0x487   :  { %v503_v60 = vpop.xlane.xlu0 %502 }
 0x488   :  { %v506_v61 = vmul.f32 0.03125, %v503_v60  ;;  %v509_v62 = vmul.f32 %v3460_v59, %v3460_v59 }
 0x48a   :  { %v3464_v63 = vsub.f32 %v495_v54, %v506_v61  ;;  %v511_v0 = vsel %vm136_vm1, %v509_v62, 0.0  ;;  %v3551_v54 = vld [vmem:[#allocation2 + $0x50] sm:$0xff] }
 0x48b   :  { %512 = vadd.xlane.f32.xlu1 %v511_v0  ;;  %v3605_v0 = vld [vmem:[%s3992_s4 + $0xc] ss:$0 sm:$0xff] }
 0x48c   :  { %v510_v1 = vmul.f32 %v3464_v63, %v3464_v63 }
 0x48e   :  { %v514_v2 = vsel %vm136_vm1, %v510_v1, 0.0 }
 0x48f   :  { %515 = vadd.xlane.f32.xlu1 %v514_v2 }
 0x4a0   :  { %718 = vrot.lane.b32.xlu1 %v630_v13, %s3393_s16 }
 0x514   :  { %v513_v14 = vpop.xlane.xlu1 %512 }
 0x515   :  { %v517_v15 = vmul.f32 0.03125, %v513_v14 }
 0x517   :  { %v519_v16 = vadd.f32 1e-05, %v517_v15  ;;  %v2681_v15 = vld [vmem:[%s3990_s2 + $0x2] sm:$0x3] }
 0x518   :  { %v516_v17 = vpop.xlane.xlu1 %515 }
 0x519   :  { %3213 = vrsqrt.f32 %v519_v16  ;;  %v518_v18 = vmul.f32 0.03125, %v516_v17 }
 0x51b   :  { %v520_v19 = vadd.f32 1e-05, %v518_v18 }
 0x51c   :  { %v719_v45 = vpop.permute.xlu1 %718 }
 0x51d   :  { %3215 = vrsqrt.f32 %v520_v19 }
 0x526   :  { %v3214_v20 = vpop.eup %3213 }
 0x527   :  { %v523_v22 = vmul.f32 %v3214_v20, %v3460_v59 }
 0x529   :  { %v529_v24 = vmul.f32 %v2675_v21, %v523_v22 }
 0x52a   :  { %v3216_v25 = vpop.eup %3215 }
 0x52b   :  { %v524_v26 = vmul.f32 %v3216_v25, %v3464_v63  ;;  %v535_v27 = vadd.f32 %v2676_v23, %v529_v24 }
 0x52d   :  { %v530_v28 = vmul.f32 %v2675_v21, %v524_v26  ;;  %2940 = vmatprep.mubr.msk.f32.mxu1 %vm136_vm1, %v535_v27 }
 0x52f   :  { %v536_v29 = vadd.f32 %v2676_v23, %v530_v28 }
 0x531   :  { %2941 = vmatmul.mubr.msk.f32.vlgmr.msra.gmra.mxu1 %vm136_vm1, %v536_v29 }
 0x532   :  { %2970 = vmatprep.mubr.msk.f32.mxu1 %vm3392_vm2, %v3391_v6  ;;  %2955 = vmatpush3.msra.mxu1 %v3533_v49 }
 0x533   :  { %2956 = vmatprep.subr.mxu1 %v3391_v6 }
 0x534   :  { %2957 = vmatpush3.msra.mxu1 %v3535_v50 }
 0x535   :  { %2958 = vmatprep.subr.mxu1 %v3391_v6 }
 0x536   :  { %2959 = vmatpush3.msra.mxu1 %v3539_v51 }
 0x537   :  { %2960 = vmatprep.subr.mxu1 %v3391_v6 }
 0x538   :  { %2961 = vmatpush3.msra.mxu1 %v3543_v52 }
 0x539   :  { %2962 = vmatprep.subr.mxu1 %v3391_v6 }
 0x53a   :  { %2963 = vmatpush3.msra.mxu1 %v3547_v53 }
 0x53b   :  { %2964 = vmatprep.subr.mxu1 %v3391_v6 }
 0x53c   :  { %2965 = vmatpush3.msra.mxu1 %v3551_v54 }
 0x53d   :  { %2966 = vmatprep.subr.mxu1 %v3391_v6 }
 0x53e   :  { %2967 = vmatpush3.msra.mxu1 %v3555_v56 }
 0x53f   :  { %2968 = vmatprep.subr.mxu1 %v3391_v6 }
 0x540   :  { %2969 = vmatpush3.msra.mxu1 %v3566_v58 }
 0x541   :  { %3003 = vmatprep.subr.mxu1 %v3391_v6 }
 0x5f1   :  { %v2942_v33 = vpop.f32.mrf.mxu1 }
 0x5f2   :  { %v3523_v34 = vadd.f32 %v2942_v33, %v2677_v32 }
 0x5f3   :  { %v618_v35 = vpop.f32.mrf.mxu1 }
 0x5f4   :  { %v3525_v36 = vadd.f32 %v2677_v32, %v618_v35 }
 0x5f6   :  { %v710_v37 = vadd.f32 %v706_v30, %v3525_v36 }
 0x5f8   :  { %3217 = vtanh.f32 %v710_v37  ;;  %v2683_v39 = vmul.f32 -1.442695, %v710_v37 }
 0x5fa   :  { %3219 = vpow2.f32 %v2683_v39 }
 0x605   :  { %v3218_v38 = vpop.eup %3217 }
 0x606   :  { %724 = vrot.lane.b32.xlu0 %v3218_v38, %s3394_s23 }
 0x607   :  { %v3220_v40 = vpop.eup %3219 }
 0x608   :  { %v714_v41 = vadd.f32 1.0, %v3220_v40 }
 0x60a   :  { %3221 = vrcp.f32 %v714_v41 }
 0x617   :  { %v3222_v42 = vpop.eup %3221 }
 0x618   :  { %v721_v46 = vmul.f32 %v3222_v42, %v719_v45 }
 0x678   :  { %v725_v43 = vpop.permute.xlu0 %724 }
 0x679   :  { %v727_v44 = vmul.f32 %v3222_v42, %v725_v43 }
 0x67b   :  { %729 = vrot.lane.b32.xlu1 %v727_v44, %s3393_s16 }
 0x6ed   :  { %v730_v47 = vpop.permute.xlu1 %729 }
 0x6ee   :  { %v3530_v48 = vadd.f32 %v730_v47, %v721_v46 }
 0x6f0   :  { %3223 = vtanh.f32 %v3530_v48  ;;  %v946_v29 = vrot.slane %v3530_v48, 6 }
 0x6fd   :  { %v3224_v55 = vpop.eup %3223 }
 0x6fe   :  { %735 = vrot.lane.b32.xlu1 %v3224_v55, %s3394_s23 }
 0x702   :  { %744 = vrot.lane.b32.xlu1 %v2680_v57, %s3393_s16 }
 0x770   :  { %v736_v59 = vpop.permute.xlu1 %735 }
 0x771   :  { %v738_v60 = vmul.f32 %v3222_v42, %v736_v59 }
 0x773   :  { %740 = vrot.lane.b32.xlu0 %v738_v60, %s3393_s16 }
 0x774   :  { %v745_v61 = vpop.permute.xlu1 %744 }
 0x7e5   :  { %v741_v62 = vpop.permute.xlu0 %740 }
 0x7e6   :  { %v747_v63 = vsel %vm136_vm1, %v741_v62, %v745_v61  ;;  %2982 = vmatmul.mubr.msk.f32.vlgmr.msra.gmra.mxu0 %vm136_vm1, %v741_v62 }
 0x7e7   :  { %2971 = vmatmul.mubr.msk.f32.vlgmr.msra.gmra.mxu1 %vm761_vm3, %v747_v63  ;;  %2985 = vmatpush3.msra.mxu0 %v3533_v49 }
 0x7e8   :  { %2986 = vmatprep.subr.mxu0 %v3391_v6  ;;  %3004 = vmatpush3.msra.mxu1 %v3470_v5 }
 0x7e9   :  { %2987 = vmatpush3.msra.mxu0 %v3535_v50  ;;  %3005 = vmatprep.subr.mxu1 %v3391_v6 }
 0x7ea   :  { %2988 = vmatprep.subr.mxu0 %v3391_v6  ;;  %3006 = vmatpush3.msra.mxu1 %v3475_v8 }
 0x7eb   :  { %2989 = vmatpush3.msra.mxu0 %v3539_v51  ;;  %3007 = vmatprep.subr.mxu1 %v3391_v6 }
 0x7ec   :  { %2990 = vmatprep.subr.mxu0 %v3391_v6  ;;  %3008 = vmatpush3.msra.mxu1 %v3479_v10 }
 0x7ed   :  { %2991 = vmatpush3.msra.mxu0 %v3543_v52  ;;  %3009 = vmatprep.subr.mxu1 %v3391_v6 }
 0x7ee   :  { %2992 = vmatprep.subr.mxu0 %v3391_v6  ;;  %3000 = vmatprep.mubr.msk.f32.mxu0 %vm3392_vm2, %v3391_v6 }
 0x7ef   :  { %2993 = vmatpush3.msra.mxu0 %v3547_v53  ;;  %3010 = vmatpush3.msra.mxu1 %v3483_v11 }
 0x7f0   :  { %2994 = vmatprep.subr.mxu0 %v3391_v6  ;;  %3011 = vmatprep.mubr.msk.f32.mxu1 %vm3392_vm2, %v3391_v6 }
 0x7f1   :  { %2995 = vmatpush3.msra.mxu0 %v3551_v54  ;;  %3014 = vmatprep.subr.mxu1 %v3391_v6 }
 0x7f2   :  { %2996 = vmatprep.subr.mxu0 %v3391_v6 }
 0x7f3   :  { %2997 = vmatpush3.msra.mxu0 %v3555_v56 }
 0x7f4   :  { %2998 = vmatprep.subr.mxu0 %v3391_v6 }
 0x7f5   :  { %2999 = vmatpush3.msra.mxu0 %v3566_v58 }
 0x7f6   :  { %3033 = vmatprep.subr.mxu0 %v3391_v6 }
 0x8a6   :  { %v931_v1 = vpop.f32.mrf.mxu0 }
 0x8a7   :  { %v936_v2 = vrot.slane %v931_v1, 6  ;;  %v831_v3 = vpop.f32.mrf.mxu1 }
 0x8a8   :  { %v832_v4 = vadd.f32 %v3605_v0, %v831_v3  ;;  %v2983_v7 = vpop.f32.mrf.mxu0 }
 0x8a9   :  { %v938_v9 = vadd.f32 %v936_v2, %v3525_v36  ;;  %v2972_v12 = vpop.f32.mrf.mxu1 }
 0x8aa   :  { %3225 = vtanh.f32 %v832_v4  ;;  %v2686_v16 = vmul.f32 -1.442695, %v832_v4 }
 0x8ab   :  { %3227 = vtanh.f32 %v938_v9  ;;  %v2688_v17 = vmul.f32 -1.442695, %v938_v9 }
 0x8ac   :  { %3229 = vpow2.f32 %v2686_v16 }
 0x8ad   :  { %3231 = vpow2.f32 %v2688_v17 }
 0x8b7   :  { %v3226_v13 = vpop.eup %3225 }
 0x8b8   :  { %v3228_v14 = vpop.eup %3227  ;;  %848 = vrot.lane.b32.xlu0 %v3226_v13, %s3394_s23 }
 0x8b9   :  { %951 = vrot.lane.b32.xlu1 %v3228_v14, %s3394_s23  ;;  %v3230_v18 = vpop.eup %3229 }
 0x8ba   :  { %v3232_v19 = vpop.eup %3231  ;;  %v838_v20 = vadd.f32 1.0, %v3230_v18 }
 0x8bb   :  { %v942_v21 = vadd.f32 1.0, %v3232_v19 }
 0x8bc   :  { %842 = vrot.lane.b32.xlu0 %v2681_v15, %s3393_s16  ;;  %3233 = vrcp.f32 %v838_v20 }
 0x8bd   :  { %3235 = vrcp.f32 %v942_v21 }
 0x8c9   :  { %v3234_v22 = vpop.eup %3233 }
 0x8ca   :  { %v3236_v24 = vpop.eup %3235 }
 0x8cb   :  { %v948_v32 = vmul.f32 %v3236_v24, %v946_v29 }
 0x92a   :  { %v849_v23 = vpop.permute.xlu0 %848 }
 0x92b   :  { %v851_v25 = vmul.f32 %v3234_v22, %v849_v23  ;;  %v952_v26 = vpop.permute.xlu1 %951 }
 0x92c   :  { %v954_v27 = vmul.f32 %v3236_v24, %v952_v26 }
 0x92d   :  { %853 = vrot.lane.b32.xlu1 %v851_v25, %s3393_s16 }
 0x92e   :  { %956 = vrot.lane.b32.xlu0 %v954_v27, %s3393_s16  ;;  %v843_v28 = vpop.permute.xlu0 %842 }
 0x92f   :  { %v845_v30 = vmul.f32 %v3234_v22, %v843_v28 }
 0x99f   :  { %v854_v31 = vpop.permute.xlu1 %853 }
 0x9a0   :  { %v3618_v33 = vadd.f32 %v854_v31, %v845_v30  ;;  %v957_v35 = vpop.permute.xlu0 %956 }
 0x9a1   :  { %v3620_v37 = vadd.f32 %v957_v35, %v948_v32 }
 0x9a2   :  { %3237 = vtanh.f32 %v3618_v33 }
 0x9a3   :  { %3239 = vtanh.f32 %v3620_v37  ;;  %v1160_v23 = vrot.slane %v3620_v37, 6 }
 0x9af   :  { %v3238_v38 = vpop.eup %3237 }
 0x9b0   :  { %v3240_v39 = vpop.eup %3239  ;;  %859 = vrot.lane.b32.xlu1 %v3238_v38, %s3394_s23 }
 0x9b1   :  { %962 = vrot.lane.b32.xlu0 %v3240_v39, %s3394_s23 }
 0xa22   :  { %v860_v40 = vpop.permute.xlu1 %859 }
 0xa23   :  { %v3626_v41 = vmul.f32 %v3234_v22, %v860_v40  ;;  %v963_v42 = vpop.permute.xlu0 %962 }
 0xa24   :  { %v965_v43 = vmul.f32 %v3236_v24, %v963_v42 }
 0xa25   :  { %v971_v44 = vrot.slane %v3626_v41, 6 }
 0xa26   :  { %967 = vrot.lane.b32.xlu1 %v965_v43, %s3393_s16  ;;  %v1074_v45 = vrot.slane %v965_v43, 2 }
 0xa27   :  { %972 = vrot.lane.b32.xlu0 %v971_v44, %s3394_s23 }
 0xa2a   :  { %1075 = vrot.lane.b32.xlu1 %v1074_v45, %s3393_s16 }
 0xa98   :  { %v968_v46 = vpop.permute.xlu1 %967 }
 0xa99   :  { %v973_v47 = vpop.permute.xlu0 %972 }
 0xa9a   :  { %v975_v48 = vsel %vm136_vm1, %v968_v46, %v973_v47 }
 0xa9b   :  { %v977_v55 = vrot.slane %v975_v48, 2 }
 0xa9c   :  { %v1076_v57 = vpop.permute.xlu1 %1075 }
 0xa9d   :  { %3001 = vmatmul.mubr.msk.f32.vlgmr.msra.gmra.mxu0 %vm761_vm3, %v977_v55  ;;  %3012 = vmatmul.mubr.msk.f32.vlgmr.msra.gmra.mxu1 %vm136_vm1, %v1076_v57 }
 0xa9e   :  { %3015 = vmatpush3.msra.mxu1 %v3533_v49  ;;  %3034 = vmatpush3.msra.mxu0 %v3470_v5 }
 0xa9f   :  { %3016 = vmatprep.subr.mxu1 %v3391_v6  ;;  %3035 = vmatprep.subr.mxu0 %v3391_v6 }
 0xaa0   :  { %3017 = vmatpush3.msra.mxu1 %v3535_v50  ;;  %3036 = vmatpush3.msra.mxu0 %v3475_v8 }
 0xaa1   :  { %3018 = vmatprep.subr.mxu1 %v3391_v6  ;;  %3037 = vmatprep.subr.mxu0 %v3391_v6 }
 0xaa2   :  { %3019 = vmatpush3.msra.mxu1 %v3539_v51  ;;  %3038 = vmatpush3.msra.mxu0 %v3479_v10 }
 0xaa3   :  { %3020 = vmatprep.subr.mxu1 %v3391_v6  ;;  %3030 = vmatprep.mubr.msk.f32.mxu1 %vm3392_vm2, %v3391_v6 }
 0xaa4   :  { %3021 = vmatpush3.msra.mxu1 %v3543_v52  ;;  %3039 = vmatprep.subr.mxu0 %v3391_v6 }
 0xaa5   :  { %3022 = vmatprep.subr.mxu1 %v3391_v6  ;;  %3040 = vmatpush3.msra.mxu0 %v3483_v11 }
 0xaa6   :  { %3023 = vmatpush3.msra.mxu1 %v3547_v53  ;;  %3041 = vmatprep.mubr.msk.f32.mxu0 %vm3392_vm2, %v3391_v6 }
 0xaa7   :  { %3024 = vmatprep.subr.mxu1 %v3391_v6  ;;  %3044 = vmatprep.subr.mxu0 %v3391_v6 }
 0xaa8   :  { %3025 = vmatpush3.msra.mxu1 %v3551_v54 }
 0xaa9   :  { %3026 = vmatprep.subr.mxu1 %v3391_v6 }
 0xaaa   :  { %3027 = vmatpush3.msra.mxu1 %v3555_v56 }
 0xaab   :  { %3028 = vmatprep.subr.mxu1 %v3391_v6 }
 0xaac   :  { %3029 = vmatpush3.msra.mxu1 %v3566_v58 }
 0xaad   :  { %3063 = vmatprep.subr.mxu1 %v3391_v6 }
 0xb5d   :  { %v1046_v59 = vpop.f32.mrf.mxu0  ;;  %v1145_v60 = vpop.f32.mrf.mxu1 }
 0xb5e   :  { %v1047_v61 = vadd.f32 %v3605_v0, %v1046_v59  ;;  %v1150_v62 = vrot.slane %v1145_v60, 4 }
 0xb5f   :  { %v3002_v63 = vpop.f32.mrf.mxu0  ;;  %v3013_v1 = vpop.f32.mrf.mxu1 }
 0xb60   :  { %3241 = vtanh.f32 %v1047_v61  ;;  %v1152_v2 = vadd.f32 %v1150_v62, %v3525_v36  ;;  %v2690_v7 = vmul.f32 -1.442695, %v1047_v61 }
 0xb62   :  { %3243 = vtanh.f32 %v1152_v2  ;;  %v2692_v9 = vmul.f32 -1.442695, %v1152_v2 }
 0xb63   :  { %3245 = vpow2.f32 %v2690_v7 }
 0xb64   :  { %3247 = vpow2.f32 %v2692_v9 }
 0xb6d   :  { %v3242_v3 = vpop.eup %3241 }
 0xb6e   :  { %1059 = vrot.lane.b32.xlu0 %v3242_v3, %s3394_s23 }
 0xb6f   :  { %v3244_v4 = vpop.eup %3243 }
 0xb70   :  { %1165 = vrot.lane.b32.xlu1 %v3244_v4, %s3394_s23  ;;  %v3246_v12 = vpop.eup %3245 }
 0xb71   :  { %v3248_v13 = vpop.eup %3247  ;;  %v1053_v14 = vadd.f32 1.0, %v3246_v12 }
 0xb72   :  { %v1156_v15 = vadd.f32 1.0, %v3248_v13 }
 0xb73   :  { %3249 = vrcp.f32 %v1053_v14 }
 0xb74   :  { %3251 = vrcp.f32 %v1156_v15 }
 0xb80   :  { %v3250_v16 = vpop.eup %3249 }
 0xb81   :  { %v3252_v19 = vpop.eup %3251  ;;  %v1056_v22 = vmul.f32 %v3250_v16, %v3618_v33 }
 0xb82   :  { %v1162_v26 = vmul.f32 %v3252_v19, %v1160_v23 }
 0xbe0   :  { %v1060_v17 = vpop.permute.xlu0 %1059 }
 0xbe1   :  { %v1062_v18 = vmul.f32 %v3250_v16, %v1060_v17 }
 0xbe2   :  { %v1166_v20 = vpop.permute.xlu1 %1165 }
 0xbe3   :  { %1064 = vrot.lane.b32.xlu0 %v1062_v18, %s3393_s16  ;;  %v1168_v21 = vmul.f32 %v3252_v19, %v1166_v20 }
 0xbe5   :  { %1170 = vrot.lane.b32.xlu1 %v1168_v21, %s3393_s16 }
 0xc55   :  { %v1065_v24 = vpop.permute.xlu0 %1064 }
 0xc56   :  { %v3671_v25 = vadd.f32 %v1065_v24, %v1056_v22 }
 0xc57   :  { %v1171_v27 = vpop.permute.xlu1 %1170 }
 0xc58   :  { %3253 = vtanh.f32 %v3671_v25  ;;  %v3674_v28 = vadd.f32 %v1171_v27, %v1162_v26 }
 0xc5a   :  { %3255 = vtanh.f32 %v3674_v28 }
 0xc65   :  { %v3254_v29 = vpop.eup %3253 }
 0xc66   :  { %1070 = vrot.lane.b32.xlu0 %v3254_v29, %s3394_s23 }
 0xc67   :  { %v3256_v30 = vpop.eup %3255 }
 0xc68   :  { %1176 = vrot.lane.b32.xlu1 %v3256_v30, %s3394_s23 }
 0xcd8   :  { %v1071_v31 = vpop.permute.xlu0 %1070 }
 0xcd9   :  { %v3679_v32 = vmul.f32 %v3250_v16, %v1071_v31  ;;  %v1374_v16 = vrot.slane %v3674_v28, 6 }
 0xcda   :  { %v1177_v35 = vpop.permute.xlu1 %1176 }
 0xcdb   :  { %v1185_v33 = vrot.slane %v3679_v32, 4  ;;  %v1179_v37 = vmul.f32 %v3252_v19, %v1177_v35  ;;  %v2350_v24 = vrot.slane %v3679_v32, 6 }
 0xcdd   :  { %1186 = vrot.lane.b32.xlu1 %v1185_v33, %s3394_s23  ;;  %1181 = vrot.lane.b32.xlu0 %v1179_v37, %s3393_s16  ;;  %v1288_v38 = vrot.slane %v1179_v37, 4  ;;  %v2364_v31 = vsel %vm2363_vm4, %v3626_v41, %v2350_v24 }
 0xce1   :  { %1289 = vrot.lane.b32.xlu0 %v1288_v38, %s3393_s16 }
 0xd4f   :  { %v1187_v39 = vpop.permute.xlu1 %1186  ;;  %v1182_v40 = vpop.permute.xlu0 %1181 }
 0xd50   :  { %v1189_v42 = vsel %vm136_vm1, %v1182_v40, %v1187_v39 }
 0xd51   :  { %v1191_v43 = vrot.slane %v1189_v42, 4 }
 0xd53   :  { %v1290_v44 = vpop.permute.xlu0 %1289  ;;  %3031 = vmatmul.mubr.msk.f32.vlgmr.msra.gmra.mxu1 %vm761_vm3, %v1191_v43 }
 0xd54   :  { %3042 = vmatmul.mubr.msk.f32.vlgmr.msra.gmra.mxu0 %vm136_vm1, %v1290_v44  ;;  %3064 = vmatpush3.msra.mxu1 %v3470_v5 }
 0xd55   :  { %3045 = vmatpush3.msra.mxu0 %v3533_v49  ;;  %3065 = vmatprep.subr.mxu1 %v3391_v6 }
 0xd56   :  { %3046 = vmatprep.subr.mxu0 %v3391_v6  ;;  %3066 = vmatpush3.msra.mxu1 %v3475_v8 }
 0xd57   :  { %3047 = vmatpush3.msra.mxu0 %v3535_v50  ;;  %3067 = vmatprep.subr.mxu1 %v3391_v6 }
 0xd58   :  { %3048 = vmatprep.subr.mxu0 %v3391_v6  ;;  %3068 = vmatpush3.msra.mxu1 %v3479_v10 }
 0xd59   :  { %3049 = vmatpush3.msra.mxu0 %v3539_v51  ;;  %3060 = vmatprep.mubr.msk.f32.mxu0 %vm3392_vm2, %v3391_v6 }
 0xd5a   :  { %3050 = vmatprep.subr.mxu0 %v3391_v6  ;;  %3069 = vmatprep.subr.mxu1 %v3391_v6 }
 0xd5b   :  { %3051 = vmatpush3.msra.mxu0 %v3543_v52  ;;  %3070 = vmatpush3.msra.mxu1 %v3483_v11 }
 0xd5c   :  { %3052 = vmatprep.subr.mxu0 %v3391_v6  ;;  %3071 = vmatprep.mubr.msk.f32.mxu1 %vm3392_vm2, %v3391_v6 }
 0xd5d   :  { %3053 = vmatpush3.msra.mxu0 %v3547_v53  ;;  %3074 = vmatprep.subr.mxu1 %v3391_v6 }
 0xd5e   :  { %3054 = vmatprep.subr.mxu0 %v3391_v6 }
 0xd5f   :  { %3055 = vmatpush3.msra.mxu0 %v3551_v54 }
 0xd60   :  { %3056 = vmatprep.subr.mxu0 %v3391_v6 }
 0xd61   :  { %3057 = vmatpush3.msra.mxu0 %v3555_v56 }
 0xd62   :  { %3058 = vmatprep.subr.mxu0 %v3391_v6 }
 0xd63   :  { %3059 = vmatpush3.msra.mxu0 %v3566_v58 }
 0xd64   :  { %3093 = vmatprep.subr.mxu0 %v3391_v6 }
 0xe13   :  { %v1260_v45 = vpop.f32.mrf.mxu1 }
 0xe14   :  { %v1261_v46 = vadd.f32 %v3605_v0, %v1260_v45  ;;  %v1359_v47 = vpop.f32.mrf.mxu0 }
 0xe15   :  { %v1364_v48 = vrot.slane %v1359_v47, 2  ;;  %v3032_v55 = vpop.f32.mrf.mxu1 }
 0xe16   :  { %3257 = vtanh.f32 %v1261_v46  ;;  %v3043_v57 = vpop.f32.mrf.mxu0  ;;  %v2694_v62 = vmul.f32 -1.442695, %v1261_v46 }
 0xe17   :  { %v1366_v59 = vadd.f32 %v1364_v48, %v3525_v36 }
 0xe19   :  { %3259 = vtanh.f32 %v1366_v59  ;;  %v2696_v63 = vmul.f32 -1.442695, %v1366_v59 }
 0xe1a   :  { %3261 = vpow2.f32 %v2694_v62 }
 0xe1b   :  { %3263 = vpow2.f32 %v2696_v63 }
 0xe23   :  { %v3258_v60 = vpop.eup %3257 }
 0xe24   :  { %1273 = vrot.lane.b32.xlu1 %v3258_v60, %s3394_s23 }
 0xe26   :  { %v3260_v61 = vpop.eup %3259 }
 0xe27   :  { %1379 = vrot.lane.b32.xlu0 %v3260_v61, %s3394_s23  ;;  %v3262_v1 = vpop.eup %3261 }
 0xe28   :  { %v3264_v2 = vpop.eup %3263  ;;  %v1267_v3 = vadd.f32 1.0, %v3262_v1 }
 0xe29   :  { %v1370_v4 = vadd.f32 1.0, %v3264_v2 }
 0xe2a   :  { %3265 = vrcp.f32 %v1267_v3 }
 0xe2b   :  { %3267 = vrcp.f32 %v1370_v4 }
 0xe37   :  { %v3266_v7 = vpop.eup %3265 }
 0xe38   :  { %v3268_v12 = vpop.eup %3267  ;;  %v1270_v15 = vmul.f32 %v3266_v7, %v3671_v25 }
 0xe39   :  { %v1376_v19 = vmul.f32 %v3268_v12, %v1374_v16 }
 0xe96   :  { %v1274_v9 = vpop.permute.xlu1 %1273 }
 0xe97   :  { %v1276_v36 = vmul.f32 %v3266_v7, %v1274_v9 }
 0xe99   :  { %v1380_v13 = vpop.permute.xlu0 %1379  ;;  %1278 = vrot.lane.b32.xlu1 %v1276_v36, %s3393_s16 }
 0xe9a   :  { %v1382_v14 = vmul.f32 %v3268_v12, %v1380_v13 }
 0xe9c   :  { %1384 = vrot.lane.b32.xlu0 %v1382_v14, %s3393_s16 }
 0xf0b   :  { %v1279_v17 = vpop.permute.xlu1 %1278 }
 0xf0c   :  { %v3724_v18 = vadd.f32 %v1279_v17, %v1270_v15 }
 0xf0e   :  { %3269 = vtanh.f32 %v3724_v18  ;;  %v1385_v20 = vpop.permute.xlu0 %1384 }
 0xf0f   :  { %v3727_v21 = vadd.f32 %v1385_v20, %v1376_v19 }
 0xf11   :  { %3271 = vtanh.f32 %v3727_v21  ;;  %v1585_v9 = vrot.slane %v3727_v21, 6 }
 0xf1b   :  { %v3270_v22 = vpop.eup %3269 }
 0xf1c   :  { %1284 = vrot.lane.b32.xlu1 %v3270_v22, %s3394_s23 }
 0xf1e   :  { %v3272_v23 = vpop.eup %3271 }
 0xf1f   :  { %1390 = vrot.lane.b32.xlu0 %v3272_v23, %s3394_s23 }
 0xf8e   :  { %v1285_v25 = vpop.permute.xlu1 %1284 }
 0xf8f   :  { %v1287_v26 = vmul.f32 %v3266_v7, %v1285_v25 }
 0xf91   :  { %v1399_v27 = vrot.slane %v1287_v26, 2  ;;  %v2352_v28 = vrot.slane %v1287_v26, 4  ;;  %v1391_v29 = vpop.permute.xlu0 %1390 }
 0xf92   :  { %v1393_v30 = vmul.f32 %v3268_v12, %v1391_v29 }
 0xf93   :  { %1400 = vrot.lane.b32.xlu0 %v1399_v27, %s3394_s23  ;;  %v3737_v33 = vsel %vm2365_vm5, %v2364_v31, %v2352_v28 }
 0xf94   :  { %1395 = vrot.lane.b32.xlu1 %v1393_v30, %s3393_s16  ;;  %v1502_v35 = vrot.slane %v1393_v30, 6 }
 0xf98   :  { %1503 = vrot.lane.b32.xlu1 %v1502_v35, %s3393_s16 }
0x1005   :  { %v1401_v32 = vpop.permute.xlu0 %1400 }
0x1006   :  { %v1396_v37 = vpop.permute.xlu1 %1395 }
0x1007   :  { %v1403_v38 = vsel %vm136_vm1, %v1396_v37, %v1401_v32 }
0x1008   :  { %v1405_v39 = vrot.slane %v1403_v38, 6 }
0x100a   :  { %3061 = vmatmul.mubr.msk.f32.vlgmr.msra.gmra.mxu0 %vm761_vm3, %v1405_v39  ;;  %v1504_v40 = vpop.permute.xlu1 %1503 }
0x100b   :  { %3072 = vmatmul.mubr.msk.f32.vlgmr.msra.gmra.mxu1 %vm136_vm1, %v1504_v40  ;;  %3094 = vmatpush3.msra.mxu0 %v3470_v5 }
0x100c   :  { %3075 = vmatpush3.msra.mxu1 %v3533_v49  ;;  %3095 = vmatprep.subr.mxu0 %v3391_v6 }
0x100d   :  { %3076 = vmatprep.subr.mxu1 %v3391_v6  ;;  %3096 = vmatpush3.msra.mxu0 %v3475_v8 }
0x100e   :  { %3077 = vmatpush3.msra.mxu1 %v3535_v50  ;;  %3097 = vmatprep.subr.mxu0 %v3391_v6 }
0x100f   :  { %3078 = vmatprep.subr.mxu1 %v3391_v6  ;;  %3098 = vmatpush3.msra.mxu0 %v3479_v10 }
0x1010   :  { %3079 = vmatpush3.msra.mxu1 %v3539_v51  ;;  %3099 = vmatprep.subr.mxu0 %v3391_v6 }
0x1011   :  { %3080 = vmatprep.subr.mxu1 %v3391_v6  ;;  %3100 = vmatpush3.msra.mxu0 %v3483_v11 }
0x1012   :  { %3081 = vmatpush3.msra.mxu1 %v3543_v52  ;;  %3101 = vmatprep.mubr.msk.f32.mxu0 %vm3392_vm2, %v3391_v6 }
0x1013   :  { %3082 = vmatprep.subr.mxu1 %v3391_v6  ;;  %3090 = vmatprep.mubr.msk.f32.mxu1 %vm3392_vm2, %v3391_v6 }
0x1014   :  { %3083 = vmatpush3.msra.mxu1 %v3547_v53  ;;  %3104 = vmatprep.subr.mxu0 %v3391_v6 }
0x1015   :  { %3084 = vmatprep.subr.mxu1 %v3391_v6 }
0x1016   :  { %3085 = vmatpush3.msra.mxu1 %v3551_v54 }
0x1017   :  { %3086 = vmatprep.subr.mxu1 %v3391_v6 }
0x1018   :  { %3087 = vmatpush3.msra.mxu1 %v3555_v56 }
0x1019   :  { %3088 = vmatprep.subr.mxu1 %v3391_v6 }
0x101a   :  { %3089 = vmatpush3.msra.mxu1 %v3566_v58 }
0x101b   :  { %3123 = vmatprep.subr.mxu1 %v3391_v6 }
0x10ca   :  { %v1474_v41 = vpop.f32.mrf.mxu0 }
0x10cb   :  { %v1475_v42 = vadd.f32 %v3605_v0, %v1474_v41  ;;  %v1573_v43 = vpop.f32.mrf.mxu1 }
0x10cc   :  { %v1577_v44 = vadd.f32 %v1573_v43, %v3523_v34  ;;  %v3062_v45 = vpop.f32.mrf.mxu0 }
0x10cd   :  { %3273 = vtanh.f32 %v1475_v42  ;;  %v3073_v46 = vpop.f32.mrf.mxu1  ;;  %v2698_v55 = vmul.f32 -1.442695, %v1475_v42 }
0x10ce   :  { %3275 = vtanh.f32 %v1577_v44  ;;  %v2700_v57 = vmul.f32 -1.442695, %v1577_v44 }
0x10cf   :  { %3277 = vpow2.f32 %v2698_v55 }
0x10d0   :  { %3279 = vpow2.f32 %v2700_v57 }
0x10da   :  { %v3274_v47 = vpop.eup %3273 }
0x10db   :  { %v3276_v48 = vpop.eup %3275  ;;  %1487 = vrot.lane.b32.xlu0 %v3274_v47, %s3394_s23 }
0x10dc   :  { %1590 = vrot.lane.b32.xlu1 %v3276_v48, %s3394_s23  ;;  %v3278_v59 = vpop.eup %3277 }
0x10dd   :  { %v3280_v60 = vpop.eup %3279  ;;  %v1481_v61 = vadd.f32 1.0, %v3278_v59 }
0x10de   :  { %v1581_v62 = vadd.f32 1.0, %v3280_v60 }
0x10df   :  { %3281 = vrcp.f32 %v1481_v61 }
0x10e0   :  { %3283 = vrcp.f32 %v1581_v62 }
0x10ec   :  { %v3282_v63 = vpop.eup %3281 }
0x10ed   :  { %v3284_v2 = vpop.eup %3283  ;;  %v1484_v36 = vmul.f32 %v3282_v63, %v3724_v18 }
0x10ee   :  { %v1587_v13 = vmul.f32 %v3284_v2, %v1585_v9 }
0x114d   :  { %v1488_v1 = vpop.permute.xlu0 %1487 }
0x114e   :  { %v1490_v3 = vmul.f32 %v3282_v63, %v1488_v1  ;;  %v1591_v4 = vpop.permute.xlu1 %1590 }
0x114f   :  { %v1593_v7 = vmul.f32 %v3284_v2, %v1591_v4 }
0x1150   :  { %1492 = vrot.lane.b32.xlu0 %v1490_v3, %s3393_s16 }
0x1151   :  { %1595 = vrot.lane.b32.xlu1 %v1593_v7, %s3393_s16 }
0x11c2   :  { %v1493_v12 = vpop.permute.xlu0 %1492 }
0x11c3   :  { %v3780_v14 = vadd.f32 %v1493_v12, %v1484_v36  ;;  %v1596_v15 = vpop.permute.xlu1 %1595 }
0x11c4   :  { %v3782_v16 = vadd.f32 %v1596_v15, %v1587_v13 }
0x11c5   :  { %3285 = vtanh.f32 %v3780_v14 }
0x11c6   :  { %3287 = vtanh.f32 %v3782_v16  ;;  %v1794_v47 = vrot.slane %v3782_v16, 6  ;;  %v3353_v16 = vld [vmem:[#allocation2 + $0x38] sm:$0xff] }
0x11d2   :  { %v3286_v17 = vpop.eup %3285 }
0x11d3   :  { %v3288_v19 = vpop.eup %3287  ;;  %1498 = vrot.lane.b32.xlu0 %v3286_v17, %s3394_s23  ;;  %v3354_v17 = vld [vmem:[#allocation2 + $0x30] sm:$0xff] }
0x11d4   :  { %1601 = vrot.lane.b32.xlu1 %v3288_v19, %s3394_s23  ;;  %v3355_v19 = vld [vmem:[#allocation2 + $0x28] sm:$0xff] }
0x1245   :  { %v1499_v20 = vpop.permute.xlu0 %1498 }
0x1246   :  { %v1501_v21 = vmul.f32 %v3282_v63, %v1499_v20  ;;  %v1602_v18 = vpop.permute.xlu1 %1601 }
0x1247   :  { %v1604_v22 = vmul.f32 %v3284_v2, %v1602_v18 }
0x1248   :  { %v2354_v23 = vrot.slane %v1501_v21, 2  ;;  %1610 = vrot.lane.b32.xlu1 %v1501_v21, %s3394_s23 }
0x1249   :  { %1606 = vrot.lane.b32.xlu0 %v1604_v22, %s3393_s16 }
0x124a   :  { %v3792_v24 = vsel %vm2367_vm6, %v3737_v33, %v2354_v23 }
0x12ba   :  { %v1611_v25 = vpop.permute.xlu1 %1610 }
0x12bb   :  { %v1607_v26 = vpop.permute.xlu0 %1606 }
0x12bc   :  { %v1613_v27 = vsel %vm136_vm1, %v1607_v26, %v1611_v25  ;;  %3102 = vmatmul.mubr.msk.f32.vlgmr.msra.gmra.mxu0 %vm136_vm1, %v1607_v26 }
0x12bd   :  { %3091 = vmatmul.mubr.msk.f32.vlgmr.msra.gmra.mxu1 %vm761_vm3, %v1613_v27  ;;  %3105 = vmatpush3.msra.mxu0 %v3533_v49 }
0x12be   :  { %3106 = vmatprep.subr.mxu0 %v3391_v6  ;;  %3124 = vmatpush3.msra.mxu1 %v3470_v5 }
0x12bf   :  { %3107 = vmatpush3.msra.mxu0 %v3535_v50  ;;  %3125 = vmatprep.subr.mxu1 %v3391_v6 }
0x12c0   :  { %3108 = vmatprep.subr.mxu0 %v3391_v6  ;;  %3126 = vmatpush3.msra.mxu1 %v3475_v8 }
0x12c1   :  { %3109 = vmatpush3.msra.mxu0 %v3539_v51  ;;  %3127 = vmatprep.subr.mxu1 %v3391_v6 }
0x12c2   :  { %3110 = vmatprep.subr.mxu0 %v3391_v6  ;;  %3128 = vmatpush3.msra.mxu1 %v3479_v10 }
0x12c3   :  { %3111 = vmatpush3.msra.mxu0 %v3543_v52  ;;  %3129 = vmatprep.subr.mxu1 %v3391_v6 }
0x12c4   :  { %3112 = vmatprep.subr.mxu0 %v3391_v6  ;;  %3120 = vmatprep.mubr.msk.f32.mxu0 %vm3392_vm2, %v3391_v6 }
0x12c5   :  { %3113 = vmatpush3.msra.mxu0 %v3547_v53  ;;  %3130 = vmatpush3.msra.mxu1 %v3483_v11 }
0x12c6   :  { %3114 = vmatprep.subr.mxu0 %v3391_v6  ;;  %3131 = vmatprep.mubr.msk.f32.mxu1 %vm3392_vm2, %v3391_v6 }
0x12c7   :  { %3115 = vmatpush3.msra.mxu0 %v3551_v54  ;;  %3134 = vmatprep.subr.mxu1 %v3391_v6 }
0x12c8   :  { %3116 = vmatprep.subr.mxu0 %v3391_v6 }
0x12c9   :  { %3117 = vmatpush3.msra.mxu0 %v3555_v56 }
0x12ca   :  { %3118 = vmatprep.subr.mxu0 %v3391_v6 }
0x12cb   :  { %3119 = vmatpush3.msra.mxu0 %v3566_v58 }
0x12cc   :  { %3153 = vmatprep.subr.mxu0 %v3391_v6 }
0x137c   :  { %v1779_v5 = vpop.f32.mrf.mxu0 }
0x137d   :  { %v1784_v8 = vrot.slane %v1779_v5, 6  ;;  %v1683_v10 = vpop.f32.mrf.mxu1 }
0x137e   :  { %v1684_v11 = vadd.f32 %v3605_v0, %v1683_v10  ;;  %v3103_v28 = vpop.f32.mrf.mxu0 }
0x137f   :  { %v1786_v29 = vadd.f32 %v1784_v8, %v3523_v34  ;;  %v3092_v30 = vpop.f32.mrf.mxu1 }
0x1380   :  { %3289 = vtanh.f32 %v1684_v11  ;;  %v2702_v35 = vmul.f32 -1.442695, %v1684_v11 }
0x1381   :  { %3291 = vtanh.f32 %v1786_v29  ;;  %v2704_v32 = vmul.f32 -1.442695, %v1786_v29 }
0x1382   :  { %3293 = vpow2.f32 %v2702_v35 }
0x1383   :  { %3295 = vpow2.f32 %v2704_v32 }
0x138d   :  { %v3290_v31 = vpop.eup %3289 }
0x138e   :  { %v3292_v33 = vpop.eup %3291  ;;  %1696 = vrot.lane.b32.xlu0 %v3290_v31, %s3394_s23 }
0x138f   :  { %1799 = vrot.lane.b32.xlu1 %v3292_v33, %s3394_s23  ;;  %v3294_v37 = vpop.eup %3293 }
0x1390   :  { %v3296_v38 = vpop.eup %3295  ;;  %v1690_v39 = vadd.f32 1.0, %v3294_v37 }
0x1391   :  { %v1790_v40 = vadd.f32 1.0, %v3296_v38 }
0x1392   :  { %3297 = vrcp.f32 %v1690_v39 }
0x1393   :  { %3299 = vrcp.f32 %v1790_v40 }
0x139f   :  { %v3298_v41 = vpop.eup %3297 }
0x13a0   :  { %v3300_v43 = vpop.eup %3299  ;;  %v1693_v48 = vmul.f32 %v3298_v41, %v3780_v14 }
0x13a1   :  { %v1796_v57 = vmul.f32 %v3300_v43, %v1794_v47 }
0x1400   :  { %v1697_v42 = vpop.permute.xlu0 %1696 }
0x1401   :  { %v1699_v44 = vmul.f32 %v3298_v41, %v1697_v42  ;;  %v1800_v45 = vpop.permute.xlu1 %1799 }
0x1402   :  { %v1802_v46 = vmul.f32 %v3300_v43, %v1800_v45 }
0x1403   :  { %1701 = vrot.lane.b32.xlu0 %v1699_v44, %s3393_s16 }
0x1404   :  { %1804 = vrot.lane.b32.xlu1 %v1802_v46, %s3393_s16 }
0x1475   :  { %v1702_v55 = vpop.permute.xlu0 %1701 }
0x1476   :  { %v3833_v59 = vadd.f32 %v1702_v55, %v1693_v48  ;;  %v1805_v60 = vpop.permute.xlu1 %1804 }
0x1477   :  { %v3835_v61 = vadd.f32 %v1805_v60, %v1796_v57  ;;  %v3358_v60 = vld [vmem:[#allocation2 + $0x70] sm:$0xff] }
0x1478   :  { %3301 = vtanh.f32 %v3833_v59 }
0x1479   :  { %3303 = vtanh.f32 %v3835_v61  ;;  %v2008_v30 = vrot.slane %v3835_v61, 6  ;;  %v3359_v61 = vld [vmem:[#allocation2 + $0x68] sm:$0xff] }
0x1485   :  { %v3302_v62 = vpop.eup %3301 }
0x1486   :  { %v3304_v63 = vpop.eup %3303  ;;  %1707 = vrot.lane.b32.xlu0 %v3302_v62, %s3394_s23  ;;  %v3360_v62 = vld [vmem:[#allocation2 + $0x60] sm:$0xff] }
0x1487   :  { %1810 = vrot.lane.b32.xlu1 %v3304_v63, %s3394_s23  ;;  %v3361_v63 = vld [vmem:[#allocation2 + $0x58] sm:$0xff] }
0x14f8   :  { %v1708_v1 = vpop.permute.xlu0 %1707 }
0x14f9   :  { %v3841_v2 = vmul.f32 %v3298_v41, %v1708_v1  ;;  %v1811_v3 = vpop.permute.xlu1 %1810  ;;  %v3362_v1 = vld [vmem:[#allocation2 + $0x50] sm:$0xff] }
0x14fa   :  { %v1813_v4 = vmul.f32 %v3300_v43, %v1811_v3  ;;  %v3363_v3 = vld [vmem:[#allocation2 + $0x48] sm:$0xff] }
0x14fb   :  { %v1819_v7 = vrot.slane %v3841_v2, 6 }
0x14fc   :  { %1815 = vrot.lane.b32.xlu0 %v1813_v4, %s3393_s16  ;;  %v1922_v9 = vrot.slane %v1813_v4, 2  ;;  %v3364_v4 = vld [vmem:[#allocation2 + $0x40] sm:$0xff] }
0x14fd   :  { %1820 = vrot.lane.b32.xlu1 %v1819_v7, %s3394_s23 }
0x1500   :  { %1923 = vrot.lane.b32.xlu0 %v1922_v9, %s3393_s16  ;;  %v3365_v9 = vld [vmem:[%s3992_s4 + $0xc] ss:$0 sm:$0xff] }
0x156e   :  { %v1816_v36 = vpop.permute.xlu0 %1815 }
0x156f   :  { %v1821_v12 = vpop.permute.xlu1 %1820 }
0x1570   :  { %v1823_v13 = vsel %vm136_vm1, %v1816_v36, %v1821_v12 }
0x1571   :  { %v1825_v14 = vrot.slane %v1823_v13, 2 }
0x1572   :  { %v1924_v15 = vpop.permute.xlu0 %1923 }
0x1573   :  { %3121 = vmatmul.mubr.msk.f32.vlgmr.msra.gmra.mxu0 %vm761_vm3, %v1825_v14  ;;  %3132 = vmatmul.mubr.msk.f32.vlgmr.msra.gmra.mxu1 %vm136_vm1, %v1924_v15 }
0x1574   :  { %3135 = vmatpush3.msra.mxu1 %v3533_v49  ;;  %3154 = vmatpush3.msra.mxu0 %v3353_v16  ;;  %v3356_v49 = vld [vmem:[#allocation2 + $0x20] sm:$0xff] }
0x1575   :  { %3136 = vmatprep.subr.mxu1 %v3391_v6  ;;  %3155 = vmatprep.subr.mxu0 %v3391_v6 }
0x1576   :  { %3137 = vmatpush3.msra.mxu1 %v3535_v50  ;;  %3156 = vmatpush3.msra.mxu0 %v3354_v17 }
0x1577   :  { %3138 = vmatprep.subr.mxu1 %v3391_v6  ;;  %3157 = vmatprep.subr.mxu0 %v3391_v6 }
0x1578   :  { %3139 = vmatpush3.msra.mxu1 %v3539_v51  ;;  %3158 = vmatpush3.msra.mxu0 %v3355_v19 }
0x1579   :  { %3140 = vmatprep.subr.mxu1 %v3391_v6  ;;  %3150 = vmatprep.mubr.msk.f32.mxu1 %vm3392_vm2, %v3391_v6 }
0x157a   :  { %3141 = vmatpush3.msra.mxu1 %v3543_v52  ;;  %3159 = vmatprep.subr.mxu0 %v3391_v6 }
0x157b   :  { %3142 = vmatprep.subr.mxu1 %v3391_v6  ;;  %3160 = vmatpush3.msra.mxu0 %v3356_v49 }
0x157c   :  { %3143 = vmatpush3.msra.mxu1 %v3547_v53  ;;  %3161 = vmatprep.mubr.msk.f32.mxu0 %vm3392_vm2, %v3391_v6 }
0x157d   :  { %3144 = vmatprep.subr.mxu1 %v3391_v6  ;;  %3164 = vmatprep.subr.mxu0 %v3391_v6 }
0x157e   :  { %3145 = vmatpush3.msra.mxu1 %v3551_v54 }
0x157f   :  { %3146 = vmatprep.subr.mxu1 %v3391_v6 }
0x1580   :  { %3147 = vmatpush3.msra.mxu1 %v3555_v56 }
0x1581   :  { %3148 = vmatprep.subr.mxu1 %v3391_v6 }
0x1582   :  { %3149 = vmatpush3.msra.mxu1 %v3566_v58 }
0x1633   :  { %v1894_v50 = vpop.f32.mrf.mxu0  ;;  %v1993_v51 = vpop.f32.mrf.mxu1 }
0x1634   :  { %v1895_v52 = vadd.f32 %v3605_v0, %v1894_v50  ;;  %v1998_v53 = vrot.slane %v1993_v51, 4 }
0x1635   :  { %v3122_v20 = vpop.f32.mrf.mxu0  ;;  %v3133_v21 = vpop.f32.mrf.mxu1 }
0x1636   :  { %3305 = vtanh.f32 %v1895_v52  ;;  %v2000_v18 = vadd.f32 %v1998_v53, %v3523_v34  ;;  %v2706_v56 = vmul.f32 -1.442695, %v1895_v52 }
0x1638   :  { %3307 = vtanh.f32 %v2000_v18  ;;  %v2708_v23 = vmul.f32 -1.442695, %v2000_v18 }
0x1639   :  { %3309 = vpow2.f32 %v2706_v56 }
0x163a   :  { %3311 = vpow2.f32 %v2708_v23 }
0x1643   :  { %v3306_v54 = vpop.eup %3305 }
0x1644   :  { %1907 = vrot.lane.b32.xlu1 %v3306_v54, %s3394_s23 }
0x1645   :  { %v3308_v22 = vpop.eup %3307 }
0x1646   :  { %2013 = vrot.lane.b32.xlu0 %v3308_v22, %s3394_s23  ;;  %v3310_v58 = vpop.eup %3309 }
0x1647   :  { %v3312_v25 = vpop.eup %3311  ;;  %v1901_v0 = vadd.f32 1.0, %v3310_v58 }
0x1648   :  { %v2004_v26 = vadd.f32 1.0, %v3312_v25 }
0x1649   :  { %3313 = vrcp.f32 %v1901_v0 }
0x164a   :  { %3315 = vrcp.f32 %v2004_v26 }
0x1656   :  { %v3314_v27 = vpop.eup %3313 }
0x1657   :  { %v3316_v10 = vpop.eup %3315  ;;  %v1904_v29 = vmul.f32 %v3314_v27, %v3833_v59  ;;  %v3357_v59 = vld [vmem:[#allocation2 + $0x78] sm:$0xff] }
0x1658   :  { %v2010_v35 = vmul.f32 %v3316_v10, %v2008_v30 }
0x16b6   :  { %v1908_v5 = vpop.permute.xlu1 %1907 }
0x16b7   :  { %v1910_v8 = vmul.f32 %v3314_v27, %v1908_v5 }
0x16b8   :  { %v2014_v11 = vpop.permute.xlu0 %2013 }
0x16b9   :  { %1912 = vrot.lane.b32.xlu1 %v1910_v8, %s3393_s16  ;;  %v2016_v28 = vmul.f32 %v3316_v10, %v2014_v11 }
0x16bb   :  { %2018 = vrot.lane.b32.xlu0 %v2016_v28, %s3393_s16 }
0x172b   :  { %v1913_v31 = vpop.permute.xlu1 %1912 }
0x172c   :  { %v3881_v33 = vadd.f32 %v1913_v31, %v1904_v29 }
0x172d   :  { %v2019_v32 = vpop.permute.xlu0 %2018 }
0x172e   :  { %3317 = vtanh.f32 %v3881_v33  ;;  %v3884_v37 = vadd.f32 %v2019_v32, %v2010_v35 }
0x1730   :  { %3319 = vtanh.f32 %v3884_v37  ;;  %v2222_v58 = vrot.slane %v3884_v37, 6 }
0x173b   :  { %v3318_v38 = vpop.eup %3317 }
0x173c   :  { %1918 = vrot.lane.b32.xlu1 %v3318_v38, %s3394_s23 }
0x173d   :  { %v3320_v39 = vpop.eup %3319 }
0x173e   :  { %2024 = vrot.lane.b32.xlu0 %v3320_v39, %s3394_s23 }
0x17ae   :  { %v1919_v40 = vpop.permute.xlu1 %1918 }
0x17af   :  { %v3889_v41 = vmul.f32 %v3314_v27, %v1919_v40 }
0x17b0   :  { %v2025_v43 = vpop.permute.xlu0 %2024 }
0x17b1   :  { %v2033_v42 = vrot.slane %v3889_v41, 4  ;;  %v2027_v44 = vmul.f32 %v3316_v10, %v2025_v43  ;;  %v2356_v11 = vrot.slane %v3889_v41, 6 }
0x17b3   :  { %2034 = vrot.lane.b32.xlu0 %v2033_v42, %s3394_s23  ;;  %2029 = vrot.lane.b32.xlu1 %v2027_v44, %s3393_s16  ;;  %v2136_v45 = vrot.slane %v2027_v44, 4  ;;  %v2369_v32 = vsel %vm2363_vm4, %v3841_v2, %v2356_v11 }
0x17b7   :  { %2137 = vrot.lane.b32.xlu1 %v2136_v45, %s3393_s16 }
0x1825   :  { %v2035_v46 = vpop.permute.xlu0 %2034  ;;  %v2030_v47 = vpop.permute.xlu1 %2029 }
0x1826   :  { %v2037_v48 = vsel %vm136_vm1, %v2030_v47, %v2035_v46 }
0x1827   :  { %v2039_v55 = vrot.slane %v2037_v48, 4 }
0x1829   :  { %v2138_v57 = vpop.permute.xlu1 %2137  ;;  %3151 = vmatmul.mubr.msk.f32.vlgmr.msra.gmra.mxu1 %vm761_vm3, %v2039_v55 }
0x182a   :  { %3162 = vmatmul.mubr.msk.f32.vlgmr.msra.gmra.mxu0 %vm136_vm1, %v2138_v57 }
0x182b   :  { %3165 = vmatpush3.msra.mxu0 %v3357_v59  ;;  %3180 = vmatprep.mubr.msk.f32.mxu0 %vm3392_vm2, %v3391_v6 }
0x182c   :  { %3166 = vmatprep.subr.mxu0 %v3391_v6 }
0x182d   :  { %3167 = vmatpush3.msra.mxu0 %v3358_v60 }
0x182e   :  { %3168 = vmatprep.subr.mxu0 %v3391_v6 }
0x182f   :  { %3169 = vmatpush3.msra.mxu0 %v3359_v61 }
0x1830   :  { %3170 = vmatprep.subr.mxu0 %v3391_v6 }
0x1831   :  { %3171 = vmatpush3.msra.mxu0 %v3360_v62 }
0x1832   :  { %3172 = vmatprep.subr.mxu0 %v3391_v6 }
0x1833   :  { %3173 = vmatpush3.msra.mxu0 %v3361_v63 }
0x1834   :  { %3174 = vmatprep.subr.mxu0 %v3391_v6 }
0x1835   :  { %3175 = vmatpush3.msra.mxu0 %v3362_v1 }
0x1836   :  { %3176 = vmatprep.subr.mxu0 %v3391_v6 }
0x1837   :  { %3177 = vmatpush3.msra.mxu0 %v3363_v3 }
0x1838   :  { %3178 = vmatprep.subr.mxu0 %v3391_v6 }
0x1839   :  { %3179 = vmatpush3.msra.mxu0 %v3364_v4 }
0x18e9   :  { %v2108_v7 = vpop.f32.mrf.mxu1 }
0x18ea   :  { %v2109_v36 = vadd.f32 %v3365_v9, %v2108_v7  ;;  %v2207_v12 = vpop.f32.mrf.mxu0 }
0x18eb   :  { %v2212_v13 = vrot.slane %v2207_v12, 2  ;;  %v3152_v14 = vpop.f32.mrf.mxu1 }
0x18ec   :  { %3321 = vtanh.f32 %v2109_v36  ;;  %v3163_v15 = vpop.f32.mrf.mxu0  ;;  %v2710_v49 = vmul.f32 -1.442695, %v2109_v36 }
0x18ed   :  { %v2214_v16 = vadd.f32 %v2212_v13, %v3523_v34 }
0x18ef   :  { %3323 = vtanh.f32 %v2214_v16  ;;  %v2712_v50 = vmul.f32 -1.442695, %v2214_v16 }
0x18f0   :  { %3325 = vpow2.f32 %v2710_v49 }
0x18f1   :  { %3327 = vpow2.f32 %v2712_v50 }
0x18f9   :  { %v3322_v17 = vpop.eup %3321 }
0x18fa   :  { %2121 = vrot.lane.b32.xlu0 %v3322_v17, %s3394_s23 }
0x18fc   :  { %v3324_v19 = vpop.eup %3323 }
0x18fd   :  { %2227 = vrot.lane.b32.xlu1 %v3324_v19, %s3394_s23  ;;  %v3326_v51 = vpop.eup %3325 }
0x18fe   :  { %v3328_v52 = vpop.eup %3327  ;;  %v2115_v53 = vadd.f32 1.0, %v3326_v51 }
0x18ff   :  { %v2218_v20 = vadd.f32 1.0, %v3328_v52 }
0x1900   :  { %3329 = vrcp.f32 %v2115_v53 }
0x1901   :  { %3331 = vrcp.f32 %v2218_v20 }
0x190d   :  { %v3330_v21 = vpop.eup %3329 }
0x190e   :  { %v3332_v54 = vpop.eup %3331  ;;  %v2118_v23 = vmul.f32 %v3330_v21, %v3881_v33 }
0x190f   :  { %v2224_v26 = vmul.f32 %v3332_v54, %v2222_v58 }
0x196c   :  { %v2122_v18 = vpop.permute.xlu0 %2121 }
0x196d   :  { %v2124_v34 = vmul.f32 %v3330_v21, %v2122_v18  ;;  %v2716_v18 = vld [vmem:[%s3992_s4 + $0x8] ss:$0 sm:$0xff] }
0x196f   :  { %v2228_v22 = vpop.permute.xlu1 %2227  ;;  %2126 = vrot.lane.b32.xlu0 %v2124_v34, %s3393_s16 }
0x1970   :  { %v2230_v56 = vmul.f32 %v3332_v54, %v2228_v22 }
0x1972   :  { %2232 = vrot.lane.b32.xlu1 %v2230_v56, %s3393_s16 }
0x19e1   :  { %v2127_v25 = vpop.permute.xlu0 %2126 }
0x19e2   :  { %v2129_v0 = vadd.f32 %v2127_v25, %v2118_v23 }
0x19e4   :  { %3333 = vtanh.f32 %v2129_v0  ;;  %v2233_v27 = vpop.permute.xlu1 %2232 }
0x19e5   :  { %v3917_v5 = vadd.f32 %v2233_v27, %v2224_v26  ;;  %v2438_v26 = vld [vmem:[#allocation2 + $0x120] sm:$0xff] }
0x19e7   :  { %3335 = vtanh.f32 %v3917_v5 }
0x19f1   :  { %v3334_v8 = vpop.eup %3333 }
0x19f2   :  { %2132 = vrot.lane.b32.xlu0 %v3334_v8, %s3394_s23  ;;  %v2437_v8 = vld [vmem:[#allocation2 + $0x118] sm:$0xff] }
0x19f4   :  { %v3336_v10 = vpop.eup %3335 }
0x19f5   :  { %2238 = vrot.lane.b32.xlu1 %v3336_v10, %s3394_s23 }
0x1a64   :  { %v2133_v28 = vpop.permute.xlu0 %2132 }
0x1a65   :  { %v2135_v29 = vmul.f32 %v3330_v21, %v2133_v28 }
0x1a67   :  { %v2247_v30 = vrot.slane %v2135_v29, 2  ;;  %v2358_v31 = vrot.slane %v2135_v29, 4  ;;  %v2239_v33 = vpop.permute.xlu1 %2238 }
0x1a68   :  { %v2241_v35 = vmul.f32 %v3332_v54, %v2239_v33  ;;  %v2715_v54 = vld [vmem:[%s3992_s4 + $0x7] ss:$0 sm:$0xff] }
0x1a69   :  { %2248 = vrot.lane.b32.xlu1 %v2247_v30, %s3394_s23  ;;  %v2370_v37 = vsel %vm2365_vm5, %v2369_v32, %v2358_v31  ;;  %v2436_v30 = vld [vmem:[#allocation2 + $0x110] sm:$0xff] }
0x1a6a   :  { %2243 = vrot.lane.b32.xlu0 %v2241_v35, %s3393_s16  ;;  %v2624_v7 = vrot.slane %v2241_v35, 6  ;;  %v2629_v35 = vrot.slane %v3917_v5, 2 }
0x1adb   :  { %v2249_v38 = vpop.permute.xlu1 %2248 }
0x1adc   :  { %v2244_v39 = vpop.permute.xlu0 %2243 }
0x1add   :  { %v2251_v40 = vsel %vm136_vm1, %v2244_v39, %v2249_v38 }
0x1ade   :  { %v2253_v41 = vrot.slane %v2251_v40, 6 }
0x1ae0   :  { %3181 = vmatmul.mubr.msk.f32.vlgmr.msra.gmra.mxu0 %vm761_vm3, %v2253_v41 }
0x1ba0   :  { %v2322_v42 = vpop.f32.mrf.mxu0 }
0x1ba1   :  { %v2323_v43 = vadd.f32 %v3365_v9, %v2322_v42 }
0x1ba2   :  { %v3182_v44 = vpop.f32.mrf.mxu0 }
0x1ba3   :  { %3337 = vtanh.f32 %v2323_v43  ;;  %v2714_v2 = vmul.f32 -1.442695, %v2323_v43 }
0x1ba5   :  { %3339 = vpow2.f32 %v2714_v2  ;;  %v2535_v2 = vld [vmem:[#allocation2 + $0x148] sm:$0xff] }
0x1bb0   :  { %v3338_v45 = vpop.eup %3337 }
0x1bb1   :  { %2335 = vrot.lane.b32.xlu0 %v3338_v45, %s3394_s23 }
0x1bb2   :  { %v3340_v46 = vpop.eup %3339 }
0x1bb3   :  { %v2329_v47 = vadd.f32 1.0, %v3340_v46  ;;  %v2534_v46 = vld [vmem:[#allocation2 + $0x140] sm:$0xff] }
0x1bb5   :  { %3341 = vrcp.f32 %v2329_v47  ;;  %v2532_v47 = vld [vmem:[#allocation2 + $0x130] sm:$0xff] }
0x1bc2   :  { %v3342_v48 = vpop.eup %3341 }
0x1bc3   :  { %v2332_v59 = vmul.f32 %v3342_v48, %v2129_v0  ;;  %v2439_v0 = vld [vmem:[#allocation2 + $0x128] sm:$0xff] }
0x1bc4   :  { %3183 = vmatprep.subr.mxu1 %v2439_v0 }
0x1bc5   :  { %3184 = vmatpush3.msra.mxu1 %v2439_v0 }
0x1bc6   :  { %3185 = vmatprep.subr.mxu1 %v2438_v26 }
0x1bc7   :  { %3186 = vmatpush3.msra.mxu1 %v2438_v26 }
0x1bc8   :  { %3187 = vmatprep.subr.mxu1 %v2437_v8 }
0x1bc9   :  { %3188 = vmatpush3.msra.mxu1 %v2437_v8 }
0x1bca   :  { %3189 = vmatprep.subr.mxu1 %v2436_v30 }
0x1bcb   :  { %3190 = vmatpush3.msra.mxu1 %v2436_v30 }
0x1bcc   :  { %3194 = vmatprep.subr.mxu1 %v2535_v2 }
0x1c23   :  { %v2336_v55 = vpop.permute.xlu0 %2335 }
0x1c24   :  { %v2338_v57 = vmul.f32 %v3342_v48, %v2336_v55 }
0x1c26   :  { %2340 = vrot.lane.b32.xlu1 %v2338_v57, %s3393_s16 }
0x1c2a   :  { %2376 = vrot.lane.b32.xlu1 %v3792_v24, %s3393_s16 }
0x1c98   :  { %v2341_v60 = vpop.permute.xlu1 %2340 }
0x1c99   :  { %v3934_v61 = vadd.f32 %v2341_v60, %v2332_v59 }
0x1c9b   :  { %3343 = vtanh.f32 %v3934_v61  ;;  %v2634_v40 = vrot.slane %v3934_v61, 2 }
0x1c9c   :  { %v2377_v62 = vpop.permute.xlu1 %2376 }
0x1c9d   :  { %v2382_v63 = vsel %vm136_vm1, %v2377_v62, 0.0 }
0x1c9e   :  { %2383 = vadd.xlane.f32.xlu1 %v2382_v63  ;;  %v2720_v63 = vld [vmem:[%s3992_s4 + $0xa] ss:$0 sm:$0xff] }
0x1ca8   :  { %v3344_v1 = vpop.eup %3343 }
0x1ca9   :  { %2346 = vrot.lane.b32.xlu0 %v3344_v1, %s3394_s23 }
0x1d1b   :  { %v2347_v3 = vpop.permute.xlu0 %2346 }
0x1d1c   :  { %v2349_v4 = vmul.f32 %v3342_v48, %v2347_v3  ;;  %v2717_v48 = vld [vmem:[%s3992_s4 + $0x9] ss:$0 sm:$0xff] }
0x1d1e   :  { %v2361_v9 = vrot.slane %v2349_v4, 2  ;;  %v2626_v36 = vrot.slane %v2349_v4, 6 }
0x1d20   :  { %v2371_v12 = vsel %vm2367_vm6, %v2370_v37, %v2361_v9  ;;  %v3941_v13 = vsel %vm2363_vm4, %v2624_v7, %v2626_v36 }
0x1d21   :  { %2378 = vrot.lane.b32.xlu0 %v2371_v12, %s3393_s16 }
0x1d27   :  { %v2384_v16 = vpop.xlane.xlu1 %2383 }
0x1d28   :  { %v2388_v17 = vmul.f32 0.03125, %v2384_v16 }
0x1d2a   :  { %v2390_v19 = vsub.f32 %v3792_v24, %v2388_v17 }
0x1d2c   :  { %v2392_v49 = vmul.f32 %v2390_v19, %v2390_v19 }
0x1d93   :  { %v2379_v14 = vpop.permute.xlu0 %2378 }
0x1d94   :  { %v2385_v15 = vsel %vm136_vm1, %v2379_v14, 0.0 }
0x1d95   :  { %2386 = vadd.xlane.f32.xlu0 %v2385_v15 }
0x1dab   :  { %2396 = vrot.lane.b32.xlu0 %v2392_v49, %s3393_s16 }
0x1e1e   :  { %v2387_v50 = vpop.xlane.xlu0 %2386 }
0x1e1f   :  { %v2389_v51 = vmul.f32 0.03125, %v2387_v50 }
0x1e21   :  { %v2391_v52 = vsub.f32 %v2371_v12, %v2389_v51 }
0x1e22   :  { %v2397_v20 = vpop.permute.xlu0 %2396 }
0x1e23   :  { %v2393_v53 = vmul.f32 %v2391_v52, %v2391_v52  ;;  %v2402_v21 = vsel %vm136_vm1, %v2397_v20, 0.0 }
0x1e25   :  { %2398 = vrot.lane.b32.xlu1 %v2393_v53, %s3393_s16 }
0x1e49   :  { %2403 = vadd.xlane.f32.xlu1 %v2402_v21 }
0x1e5a   :  { %2431 = vrot.lane.b32.xlu1 %v2716_v18, %s3395_s30 }
0x1e97   :  { %v2399_v24 = vpop.permute.xlu1 %2398 }
0x1e98   :  { %v2405_v34 = vsel %vm136_vm1, %v2399_v24, 0.0 }
0x1e99   :  { %2406 = vadd.xlane.f32.xlu0 %v2405_v34 }
0x1eaf   :  { %2421 = vrot.lane.b32.xlu0 %v2715_v54, %s3395_s30 }
0x1ed2   :  { %v2404_v22 = vpop.xlane.xlu1 %2403 }
0x1ed3   :  { %v2408_v56 = vmul.f32 0.03125, %v2404_v22 }
0x1ed5   :  { %v2410_v23 = vadd.f32 1e-05, %v2408_v56 }
0x1ed6   :  { %v2432_v29 = vpop.permute.xlu1 %2431 }
0x1ed7   :  { %3345 = vrsqrt.f32 %v2410_v23 }
0x1ee4   :  { %v3346_v58 = vpop.eup %3345 }
0x1ee5   :  { %v2414_v11 = vmul.f32 %v3346_v58, %v2390_v19 }
0x1f22   :  { %v2407_v25 = vpop.xlane.xlu0 %2406 }
0x1f23   :  { %v2409_v27 = vmul.f32 0.03125, %v2407_v25 }
0x1f25   :  { %v2411_v10 = vadd.f32 1e-05, %v2409_v27 }
0x1f26   :  { %v2422_v28 = vpop.permute.xlu0 %2421 }
0x1f27   :  { %3347 = vrsqrt.f32 %v2411_v10  ;;  %v2424_v31 = vmul.f32 %v2422_v28, %v2414_v11 }
0x1f29   :  { %v2434_v33 = vadd.f32 %v2432_v29, %v2424_v31 }
0x1f2b   :  { %2447 = vrot.lane.b32.xlu1 %v2434_v33, %s3393_s16 }
0x1f2f   :  { %2630 = vrot.lane.b32.xlu1 %v2629_v35, %s3394_s23 }
0x1f34   :  { %v3348_v32 = vpop.eup %3347 }
0x1f35   :  { %v2415_v37 = vmul.f32 %v3348_v32, %v2391_v52 }
0x1f37   :  { %v2425_v38 = vmul.f32 %v2422_v28, %v2415_v37 }
0x1f39   :  { %v2435_v39 = vadd.f32 %v2432_v29, %v2425_v38 }
0x1f3b   :  { %2449 = vrot.lane.b32.xlu0 %v2435_v39, %s3393_s16 }
0x1f3f   :  { %2635 = vrot.lane.b32.xlu0 %v2634_v40, %s3394_s23 }
0x1f43   :  { %2645 = vrot.lane.b32.xlu0 %v3391_v6, %s3394_s23  ;;  %v2533_v6 = vld [vmem:[#allocation2 + $0x138] sm:$0xff] }
0x1f9d   :  { %v2448_v41 = vpop.permute.xlu1 %2447 }
0x1f9e   :  { %3191 = vmatprep.mubr.msk.f32.mxu1 %vm136_vm1, %v2448_v41 }
0x1fa1   :  { %v2631_v5 = vpop.permute.xlu1 %2630 }
0x1fa2   :  { %v2639_v43 = vsel %vm2365_vm5, %v3941_v13, %v2631_v5 }
0x1fad   :  { %v2450_v42 = vpop.permute.xlu0 %2449 }
0x1fae   :  { %3192 = vmatmul.mubr.msk.f32.vlgmr.msra.gmra.mxu1 %vm136_vm1, %v2450_v42 }
0x1faf   :  { %3195 = vmatpush3.msra.mxu1 %v2535_v2 }
0x1fb0   :  { %3196 = vmatprep.subr.mxu1 %v2534_v46 }
0x1fb1   :  { %v2636_v44 = vpop.permute.xlu0 %2635  ;;  %3197 = vmatpush3.msra.mxu1 %v2534_v46 }
0x1fb2   :  { %v2640_v45 = vsel %vm2367_vm6, %v2639_v43, %v2636_v44  ;;  %3198 = vmatprep.subr.mxu1 %v2533_v6 }
0x1fb3   :  { %2643 = vrot.lane.b32.xlu1 %v2640_v45, %s3394_s23  ;;  %3199 = vmatpush3.msra.mxu1 %v2533_v6 }
0x1fb4   :  { %3200 = vmatprep.subr.mxu1 %v2532_v47 }
0x1fb5   :  { %3201 = vmatpush3.msra.mxu1 %v2532_v47  ;;  %v2646_v9 = vpop.permute.xlu0 %2645 }
0x2025   :  { %v2644_v14 = vpop.permute.xlu1 %2643 }
0x206e   :  { %v3193_v55 = vpop.f32.mrf.mxu1 }
0x206f   :  { %v2527_v57 = vadd.f32 %v3193_v55, %v2717_v48 }
0x2070   :  { %v2521_v59 = vpop.f32.mrf.mxu1 }
0x2071   :  { %v2522_v60 = vadd.f32 %v2717_v48, %v2521_v59  ;;  %v2531_v62 = vmax.f32 %v2527_v57, 0.0 }
0x2073   :  { %v2530_v61 = vmax.f32 %v2522_v60, 0.0 }
0x2075   :  { %3202 = vmatprep.mubr.msk.f32.mxu1 %vm136_vm1, %v2530_v61 }
0x2076   :  { %3203 = vmatmul.mubr.msk.f32.vlgmr.msra.gmra.mxu1 %vm136_vm1, %v2531_v62 }
0x2136   :  { %v3204_v1 = vpop.f32.mrf.mxu1 }
0x2137   :  { %v2619_v3 = vadd.f32 %v3204_v1, %v2720_v63 }
0x2138   :  { %v2613_v4 = vpop.f32.mrf.mxu1 }
0x2139   :  { %3349 = vtanh.f32 %v2619_v3  ;;  %v2614_v7 = vadd.f32 %v2720_v63, %v2613_v4 }
0x213b   :  { %3351 = vtanh.f32 %v2614_v7 }
0x2146   :  { %v3350_v36 = vpop.eup %3349 }
0x2147   :  { %v2650_v12 = vsel %vm136_vm1, %v3350_v36, %v2646_v9 }
0x2148   :  { %v3352_v13 = vpop.eup %3351  ;;  %v2652_v15 = vsel %vm761_vm3, %v2650_v12, 0.0 }
0x2149   :  { %v2649_v16 = vsel %vm136_vm1, %v3352_v13, %v2644_v14  ;;  %2654 = vst [vmem:[%s3993_s5 + $0x8] sm:$0xff] %v2652_v15 }
0x214a   :  { %v2651_v17 = vsel %vm761_vm3, %v2649_v16, 0.0 }
0x214b   :  { %2653 = vst [vmem:[%s3993_s5] sm:$0xff] %v2651_v17 }
0x214c   :  { %2659 = vsyncpa [#allocation3], 1 }

</bundles_post_ra>
